<compile_context>
chip_gen: v6e
topology: v6e:2x2x1
jax: 0.10.0
libtpu: 0.0.40
codegen_flags: <defaults>
</compile_context>

<pallas_src>
import math
import functools

import jax
import jax.numpy as jnp
from jax import lax
from jax.experimental import pallas as pl
from jax.experimental.pallas import tpu as pltpu


# ------------------------------ Pallas kernel ------------------------------ #

def _conv_group_kernel(x_ref, w_ref, o_ref, *, K, sh, sw, Wo, tile_ho,
                       tap_concat):
    """One (group, batch, ho-tile) grid step.

    x_ref: (Hp, Wp, Cg)       padded NHWC image slab (resident per (g, n))
    w_ref: (Og, K*K*Cg)       group weights, flattened as (ki, kj, c)
    o_ref: (Og, tile_ho*Wo)   lane-dense output tile (channels x flat rows)
    """
    Cg = x_ref.shape[-1]
    Mt = tile_ho * Wo

    # Row window for this Ho tile (includes the K-1 halo rows).
    row0 = pl.multiple_of(pl.program_id(2) * (tile_ho * sh), tile_ho * sh)
    win_rows = (tile_ho - 1) * sh + K
    x_win = x_ref[pl.ds(row0, win_rows), :, :]            # (win_rows, Wp, Cg)
    w = w_ref[...]                                        # (Og, K*K*Cg)

    def tap(ki, kj):
        h_end = ki + sh * (tile_ho - 1) + 1
        w_end = kj + sw * (Wo - 1) + 1
        t = x_win[ki:h_end:sh, kj:w_end:sw, :]            # (tile_ho, Wo, Cg)
        return t.reshape(Mt, Cg)

    # dot_general contracts the LAST dim of both operands (trans_b form) so
    # the output's last (lane) dim is the flattened spatial axis.
    # TODO(synk): verify via pl.lower_as_mlir that Mosaic does not insert an
    # XLU transpose of the (Mt, Cg) operand on the target chip.
    dn = (((1,), (1,)), ((), ()))

    if tap_concat:
        # Small Cg: pack the K*K taps along the contraction axis so the MXU
        # sees one deep K*K*Cg contraction instead of K*K shallow ones.
        patches = jnp.concatenate(
            [tap(ki, kj) for ki in range(K) for kj in range(K)], axis=-1)
        acc = lax.dot_general(w, patches, dimension_numbers=dn,
                              preferred_element_type=jnp.float32)
    else:
        # Large Cg: per-tap accumulation -- no (Mt, K*K*Cg) temp in VMEM and
        # no lane-misaligned concatenate.
        acc = jnp.zeros((w.shape[0], Mt), jnp.float32)
        for ki in range(K):
            for kj in range(K):
                t_idx = ki * K + kj
                w_tap = w[:, t_idx * Cg:(t_idx + 1) * Cg]   # (Og, Cg)
                acc = acc + lax.dot_general(
                    w_tap, tap(ki, kj), dimension_numbers=dn,
                    preferred_element_type=jnp.float32)

    o_ref[...] = acc.astype(o_ref.dtype)


# ------------------------------ sizing helpers ------------------------------ #

def _vmem_capacity_bytes():
    try:
        return int(pltpu.get_tpu_info().vmem_capacity_bytes)
    except Exception:           # conservative fallback: v7x per-core capacity
        return 64 * 2 ** 20


def _choose_ho_tile(Ho, Wo, Og, Cg, Wp, K, sh, in_isz, out_isz, tap_concat,
                    budget_bytes):
    """Largest divisor of Ho whose per-tile working set fits `budget_bytes`,
    preferring tiles whose flattened spatial length is a multiple of 128."""
    def varying_bytes(tho):
        Mt = tho * Wo
        b = 2 * Og * Mt * out_isz                        # 2x-buffered out tile
        b += Og * Mt * 4                                 # f32 accumulator
        b += ((tho - 1) * sh + K) * Wp * Cg * in_isz     # row window
        if tap_concat:
            b += 2 * Mt * K * K * Cg * in_isz            # patches + concat tmp
        else:
            b += 4 * Mt * Cg * in_isz                    # live tap slices
        return b

    divisors = [d for d in range(Ho, 0, -1) if Ho % d == 0]
    fitting = [d for d in divisors if varying_bytes(d) <= budget_bytes] or [1]
    aligned = [d for d in fitting if (d * Wo) % 128 == 0]
    return (aligned or fitting)[0]


# ------------------------------ functional op ------------------------------ #

def conv2d_pallas(x, weight, *, stride=1, padding=1, groups=1,
                  compute_dtype=None, tap_concat=None, ho_tile=None):
    """x: (N, C, H, W) NCHW, weight: (O, C//G, K, K) OIHW -> (N, O, Ho, Wo)."""
    N, C, H, W = x.shape
    O, Cg_w, K, _ = weight.shape
    G = groups
    assert C % G == 0 and O % G == 0 and Cg_w == C // G
    Cg, Og = C // G, O // G
    sh = sw = int(stride)
    ph = pw = int(padding)

    Ho = (H + 2 * ph - K) // sh + 1
    Wo = (W + 2 * pw - K) // sw + 1
    Hp, Wp = H + 2 * ph, W + 2 * pw
    M = Ho * Wo
    CKK = K * K * Cg
    out_dtype = x.dtype

    if tap_concat is None:
        tap_concat = Cg < 128     # shallow groups: pack taps for MXU depth

    # ---- wrapper-side layout prep (single input-sized HBM pass) ----------- #
    x5 = x.reshape(N, G, Cg, H, W).transpose(1, 0, 3, 4, 2)   # (G,N,H,W,Cg)
    x5 = jnp.pad(x5, ((0, 0), (0, 0), (ph, ph), (pw, pw), (0, 0)))
    # Weights flattened as (ki, kj, c) to match the in-kernel tap packing.
    w3 = (weight.reshape(G, Og, Cg, K, K)
                .transpose(0, 1, 3, 4, 2)
                .reshape(G, Og, CKK))
    if compute_dtype is not None:
        # bf16-in-HBM: halves DMA bytes and VMEM block; accumulation stays f32.
        x5 = x5.astype(compute_dtype)
        w3 = w3.astype(compute_dtype)

    in_isz = jnp.dtype(x5.dtype).itemsize
    out_isz = jnp.dtype(out_dtype).itemsize

    # ---- tile selection / VMEM budget (capacity-clamped, dtype-aware) ----- #
    cap = _vmem_capacity_bytes()
    fixed = 2 * Hp * Wp * Cg * in_isz + 2 * Og * CKK * in_isz
    budget = max(4 * 2 ** 20, (cap - 16 * 2 ** 20 - fixed) // 3)
    if ho_tile is None:
        ho_tile = _choose_ho_tile(Ho, Wo, Og, Cg, Wp, K, sh, in_isz, out_isz,
                                  tap_concat, budget)
    assert Ho % ho_tile == 0, (Ho, ho_tile)
    n_ho_tiles = Ho // ho_tile
    Mt = ho_tile * Wo
    win_rows = (ho_tile - 1) * sh + K

    need = (fixed                              # image + weights (2x pipeline)
            + 2 * Og * Mt * out_isz            # output tile
            + Og * Mt * 4                      # f32 accumulator
            + win_rows * Wp * Cg * in_isz)     # row window
    need += (2 * Mt * CKK * in_isz) if tap_concat else (4 * Mt * Cg * in_isz)
    vmem_limit = int(min(max(int(need * 1.5), 32 * 2 ** 20),
                         cap - 12 * 2 ** 20))

    flops = 2 * N * G * M * CKK * Og
    bytes_accessed = int(
        x.size * jnp.dtype(x.dtype).itemsize   # wrapper relayout read
        + 2 * x5.size * in_isz                 # relayout write + kernel read
        + w3.size * in_isz                     # weights (resident across N,Ho)
        + N * O * M * out_isz)                 # output write

    kernel = functools.partial(
        _conv_group_kernel, K=K, sh=sh, sw=sw, Wo=Wo, tile_ho=ho_tile,
        tap_concat=tap_concat)

    out = pl.pallas_call(
        kernel,
        out_shape=jax.ShapeDtypeStruct((N, G, Og, M), out_dtype),
        grid_spec=pltpu.PrefetchScalarGridSpec(
            num_scalar_prefetch=0,
            grid=(G, N, n_ho_tiles),
            in_specs=[
                # Padded image for this (group, batch): block index constant
                # across the Ho axis -> DMA'd once per (g, n).
                pl.BlockSpec((None, None, Hp, Wp, Cg),
                             lambda g, n, t: (g, n, 0, 0, 0)),
                # Group weights: constant across (n, t) -> DMA'd once per g.
                pl.BlockSpec((None, Og, CKK),
                             lambda g, n, t: (g, 0, 0)),
            ],
            out_specs=pl.BlockSpec((None, None, Og, Mt),
                                   lambda g, n, t: (n, g, 0, t)),
        ),
        compiler_params=pltpu.CompilerParams(
            dimension_semantics=("parallel", "parallel", "parallel"),
            vmem_limit_bytes=vmem_limit,
        ),
        cost_estimate=pl.CostEstimate(
            flops=flops, transcendentals=0, bytes_accessed=bytes_accessed),
    )(x5, w3)

    # (N, G, Og, Ho*Wo) -> (N, O, Ho, Wo): contiguous row-major reshape (free).
    return out.reshape(N, O, Ho, Wo)


# ------------------------------ module wrapper ------------------------------ #

class SoftConv2d:
    """JAX/Pallas port of the PyTorch SoftConv2d module (conv2d, no bias)."""

    def __init__(self, in_channels, out_channels, kernel_size,
                 stride=1, padding=1, bias=False, groups=1, key=None,
                 compute_dtype=None):
        self.in_channels = in_channels
        self.out_channels = out_channels
        self.kernel_size = kernel_size
        self.stride = stride
        self.padding = padding
        self.groups = groups
        # Set compute_dtype=jnp.bfloat16 on v6e/v7x for MXU-rate matmuls
        # (wrapper-side cast, f32 accumulation).  Default None = exact f32.
        self.compute_dtype = compute_dtype
        # bias=False in the reference forward -> no bias term.

        # Deterministic kaiming_uniform_(a=sqrt(5)) equivalent init.
        if key is None:
            key = jax.random.PRNGKey(0)
        fan_in = (in_channels // groups) * kernel_size * kernel_size
        gain = math.sqrt(2.0 / (1.0 + 5.0))        # a = sqrt(5)
        bound = gain * math.sqrt(3.0 / fan_in)
        self.weight = jax.random.uniform(
            key,
            (out_channels, in_channels // groups, kernel_size, kernel_size),
            minval=-bound, maxval=bound, dtype=jnp.float32)

    def __call__(self, x):
        return conv2d_pallas(
            x, self.weight,
            stride=self.stride, padding=self.padding, groups=self.groups,
            compute_dtype=self.compute_dtype)


# ---------------------------------- main ------------------------------------ #

if __name__ == "__main__":
    key = jax.random.PRNGKey(0)
    k_x, k_w1, k_w2 = jax.random.split(key, 3)

    N, C, H, W = 2, 4, 16, 16
    O, K = 8, 3
    x = jax.random.normal(k_x, (N, C, H, W), dtype=jnp.float32)

    def ref_conv(x, w, groups):
        return jax.lax.conv_general_dilated(
            x, w, window_strides=(1, 1), padding=((1, 1), (1, 1)),
            dimension_numbers=("NCHW", "OIHW", "NCHW"),
            feature_group_count=groups)

    # 1) groups=1 (small-Cg tap-concat path, auto single Ho tile).
    conv = SoftConv2d(C, O, K, stride=1, padding=1, bias=False, groups=1,
                      key=k_w1)
    y = jax.block_until_ready(conv(x))
    y_ref = ref_conv(x, conv.weight, 1)
    assert y.shape == (N, O, H, W), y.shape
    assert jnp.allclose(y, y_ref, atol=1e-4, rtol=1e-4), float(
        jnp.max(jnp.abs(y - y_ref)))

    # 2) grouped conv (all groups + batches in one pallas_call grid).
    conv_g = SoftConv2d(C, O, K, stride=1, padding=1, bias=False, groups=2,
                        key=k_w2)
    yg = jax.block_until_ready(conv_g(x))
    yg_ref = ref_conv(x, conv_g.weight, 2)
    assert yg.shape == (N, O, H, W), yg.shape
    assert jnp.allclose(yg, yg_ref, atol=1e-4, rtol=1e-4), float(
        jnp.max(jnp.abs(yg - yg_ref)))

    # 3) per-tap accumulation path + explicit Ho row tiling (grid axis 2).
    y_t = jax.block_until_ready(conv2d_pallas(
        x, conv.weight, stride=1, padding=1, groups=1,
        tap_concat=False, ho_tile=8))
    assert jnp.allclose(y_t, y_ref, atol=1e-4, rtol=1e-4), float(
        jnp.max(jnp.abs(y_t - y_ref)))

    # 4) bf16-in-HBM compute path (f32 accumulation), relaxed tolerance.
    y_bf = jax.block_until_ready(conv2d_pallas(
        x, conv.weight, stride=1, padding=1, groups=1,
        compute_dtype=jnp.bfloat16, ho_tile=8))
    assert jnp.allclose(y_bf, y_ref, atol=1e-1, rtol=1e-1), float(
        jnp.max(jnp.abs(y_bf - y_ref)))

    print("KERNEL_OK")
</pallas_src>

<mosaic_0001>
module attributes {stable_mosaic.version = 11 : i64} {
  func.func @_conv_group_kernel(%arg0: i32, %arg1: i32, %arg2: i32, %arg3: memref<1x1x18x18x4xf32, #tpu.memory_space<vmem>>, %arg4: memref<1x8x36xf32, #tpu.memory_space<vmem>>, %arg5: memref<1x1x8x256xf32, #tpu.memory_space<vmem>>) attributes {dimension_semantics = [#tpu.dimension_semantics<parallel>, #tpu.dimension_semantics<parallel>, #tpu.dimension_semantics<parallel>], iteration_bounds = array<i64: 1, 2, 1>, scalar_prefetch = 0 : i64, scratch_operands = 0 : i64, tpu.core_type = #tpu.core_type<tc>, window_params = [{transform_indices = @transform_0, window_bounds = array<i64: 1, 1, 18, 18, 4>}, {transform_indices = @transform_1, window_bounds = array<i64: 1, 8, 36>}, {transform_indices = @transform_2, window_bounds = array<i64: 1, 1, 8, 256>}]} {
    %c16_i32 = arith.constant 16 : i32
    %0 = arith.muli %arg2, %c16_i32 : i32
    %1 = tpu.assume_multiple %0, 16 : i32
    %c0 = arith.constant 0 : index
    %c0_0 = arith.constant 0 : index
    %2 = arith.index_cast %1 : i32 to index
    %c0_1 = arith.constant 0 : index
    %c0_2 = arith.constant 0 : index
    %3 = vector.load %arg3[%c0, %c0_0, %2, %c0_1, %c0_2] : memref<1x1x18x18x4xf32, #tpu.memory_space<vmem>>, vector<1x1x18x18x4xf32>
    %4 = vector.shape_cast %3 : vector<1x1x18x18x4xf32> to vector<18x18x4xf32>
    %c0_3 = arith.constant 0 : index
    %c0_4 = arith.constant 0 : index
    %c0_5 = arith.constant 0 : index
    %5 = vector.load %arg4[%c0_3, %c0_4, %c0_5] : memref<1x8x36xf32, #tpu.memory_space<vmem>>, vector<1x8x36xf32>
    %6 = vector.shape_cast %5 : vector<1x8x36xf32> to vector<8x36xf32>
    %7 = vector.extract_strided_slice %4 {offsets = [0, 0, 0], sizes = [16, 16, 4], strides = [1, 1, 1]} : vector<18x18x4xf32> to vector<16x16x4xf32>
    %8 = vector.shape_cast %7 : vector<16x16x4xf32> to vector<256x4xf32>
    %9 = vector.extract_strided_slice %4 {offsets = [0, 1, 0], sizes = [16, 16, 4], strides = [1, 1, 1]} : vector<18x18x4xf32> to vector<16x16x4xf32>
    %10 = vector.shape_cast %9 : vector<16x16x4xf32> to vector<256x4xf32>
    %11 = vector.extract_strided_slice %4 {offsets = [0, 2, 0], sizes = [16, 16, 4], strides = [1, 1, 1]} : vector<18x18x4xf32> to vector<16x16x4xf32>
    %12 = vector.shape_cast %11 : vector<16x16x4xf32> to vector<256x4xf32>
    %13 = vector.extract_strided_slice %4 {offsets = [1, 0, 0], sizes = [16, 16, 4], strides = [1, 1, 1]} : vector<18x18x4xf32> to vector<16x16x4xf32>
    %14 = vector.shape_cast %13 : vector<16x16x4xf32> to vector<256x4xf32>
    %15 = vector.extract_strided_slice %4 {offsets = [1, 1, 0], sizes = [16, 16, 4], strides = [1, 1, 1]} : vector<18x18x4xf32> to vector<16x16x4xf32>
    %16 = vector.shape_cast %15 : vector<16x16x4xf32> to vector<256x4xf32>
    %17 = vector.extract_strided_slice %4 {offsets = [1, 2, 0], sizes = [16, 16, 4], strides = [1, 1, 1]} : vector<18x18x4xf32> to vector<16x16x4xf32>
    %18 = vector.shape_cast %17 : vector<16x16x4xf32> to vector<256x4xf32>
    %19 = vector.extract_strided_slice %4 {offsets = [2, 0, 0], sizes = [16, 16, 4], strides = [1, 1, 1]} : vector<18x18x4xf32> to vector<16x16x4xf32>
    %20 = vector.shape_cast %19 : vector<16x16x4xf32> to vector<256x4xf32>
    %21 = vector.extract_strided_slice %4 {offsets = [2, 1, 0], sizes = [16, 16, 4], strides = [1, 1, 1]} : vector<18x18x4xf32> to vector<16x16x4xf32>
    %22 = vector.shape_cast %21 : vector<16x16x4xf32> to vector<256x4xf32>
    %23 = vector.extract_strided_slice %4 {offsets = [2, 2, 0], sizes = [16, 16, 4], strides = [1, 1, 1]} : vector<18x18x4xf32> to vector<16x16x4xf32>
    %24 = vector.shape_cast %23 : vector<16x16x4xf32> to vector<256x4xf32>
    %25 = tpu.concatenate %8, %10, %12, %14, %16, %18, %20, %22, %24 in 1 : vector<256x4xf32>, vector<256x4xf32>, vector<256x4xf32>, vector<256x4xf32>, vector<256x4xf32>, vector<256x4xf32>, vector<256x4xf32>, vector<256x4xf32>, vector<256x4xf32> -> vector<256x36xf32>
    %cst = arith.constant dense<0.000000e+00> : vector<8x256xf32>
    %26 = tpu.matmul %6, %25, %cst {dimension_numbers = #tpu.dot_dimension_numbers<[1], [1], [0], [0], [0, 0, 1, 0], [], []>} : vector<8x36xf32>, vector<256x36xf32>, vector<8x256xf32> -> vector<8x256xf32>
    %c0_6 = arith.constant 0 : index
    %c0_7 = arith.constant 0 : index
    %c0_8 = arith.constant 0 : index
    %c0_9 = arith.constant 0 : index
    %27 = vector.load %arg5[%c0_6, %c0_7, %c0_8, %c0_9] : memref<1x1x8x256xf32, #tpu.memory_space<vmem>>, vector<1x1x8x256xf32>
    %28 = vector.shape_cast %27 : vector<1x1x8x256xf32> to vector<8x256xf32>
    %29 = vector.shape_cast %26 : vector<8x256xf32> to vector<1x1x8x256xf32>
    tpu.vector_store %arg5[%c0_6, %c0_7, %c0_8, %c0_9], %29 {strides = array<i32>} : memref<1x1x8x256xf32, #tpu.memory_space<vmem>>, vector<1x1x8x256xf32>,
    return
  }
  func.func @transform_0(%arg0: i32, %arg1: i32, %arg2: i32) -> (i32, i32, i32, i32, i32) {
    %c0_i32 = arith.constant 0 : i32
    %c0_i32_0 = arith.constant 0 : i32
    %c0_i32_1 = arith.constant 0 : i32
    %c0_i32_2 = arith.constant 0 : i32
    return %arg0, %arg1, %c0_i32, %c0_i32_0, %c0_i32_1 : i32, i32, i32, i32, i32
  }
  func.func @transform_1(%arg0: i32, %arg1: i32, %arg2: i32) -> (i32, i32, i32) {
    %c0_i32 = arith.constant 0 : i32
    %c0_i32_0 = arith.constant 0 : i32
    %c0_i32_1 = arith.constant 0 : i32
    return %arg0, %c0_i32, %c0_i32_0 : i32, i32, i32
  }
  func.func @transform_2(%arg0: i32, %arg1: i32, %arg2: i32) -> (i32, i32, i32, i32) {
    %c0_i32 = arith.constant 0 : i32
    %c0_i32_0 = arith.constant 0 : i32
    return %arg1, %arg0, %c0_i32, %arg2 : i32, i32, i32, i32
  }
}

</mosaic_0001>

<bundles_post_ra>
// kernel: tpu_custom_call.1
= control target key start
LH: loop header
LB: loop body
LE: loop exit
PB: predicated region body
PF: predicated region fallthrough
CT: control target
= control target key end

     0   :  { %7 = vsyncpa [#allocation3], 0  ;;  %s3770_s0 = inlined_call_operand.vmem [shape: f32[1,2,18,18,4], index: 0, kind: input, shape index: {}]   ;;  %s3771_s1 = inlined_call_operand.vmem [shape: f32[1,8,36], index: 1, kind: input, shape index: {}]   ;;  %s3772_s2 = inlined_call_operand.hbm [shape: f32[2,1,8,256], index: 2, kind: output, shape index: {}]  }
   0x1   :  { %9 = vsyncpa [#allocation3 + $0x1], 0  ;;  %s2084_s9 = smov 0   ;;  %s2086_s10 = smov 0  }
   0x2   :  { %s2088_s11 = smov 0   ;;  %s2090_s12 = smov 0  }
   0x3   :  { %s2092_s13 = smov 0   ;;  %s2094_s14 = smov 0  }
   0x4 LB: > { %s1816_s15 = sadd.s32 4294967295, %s2058_s14   ;;  %s1817_s16 = sadd.s32 4294967294, %s2058_s14   ;;  %s2058_s14 = sphi %s2094_s14, %s15_s14   ;;  %s2054_s13 = sphi %s2092_s13, %s4085_s13   ;;  %s2050_s12 = sphi %s2090_s12, %s4084_s12   ;;  %s2046_s11 = sphi %s2088_s11, %s4083_s11   ;;  %s2042_s10 = sphi %s2086_s10, %s4082_s10   ;;  %s2038_s9 = sphi %s2084_s9, %s4081_s9  }
   0x5   : > { %s30_s17 = sadd.s32 1, %s2054_s13  ;;  %s99_s18 = sadd.s32 1, %s2046_s11 }
   0x6   : > { %p32_p0 = scmp.ge.s32.totalorder %s30_s17, 2  ;;  %p109_p1 = scmp.ne.s32.totalorder %s2046_s11, %s2042_s10 }
   0x7   : > { %p110_p2 = scmp.eq.s32.totalorder %s1816_s15, 1  ;;  %p115_p3 = scmp.ne.s32.totalorder %s2042_s10, %s2038_s9 }
   0x8   : > { %s4087_s17 = smov (%p32_p0, %s30_s17), 0  ;;  %p116_p5 = scmp.eq.s32.totalorder %s1817_s16, 1 }
   0x9   : > { %p2124_p4 = por %p110_p2, %p109_p1  ;;  %s92_s20 = ssub.s32 %s2054_s13, %s4087_s17 }
   0xa   : > { %p1821_p6 = scmp.ge.s32.totalorder %s2058_s14, 1  ;;  %p97_p7 = scmp.eq.s32.totalorder %s92_s20, 0 }
   0xb   : > { %p2131_p8 = por %p116_p5, %p115_p3  ;;  %p153_p9 = scmp.lt.s32.totalorder %s2058_s14, 3 }
   0xc   : > { %s2137_s22 = scalar_select %p97_p7, %s2046_s11, %s99_s18  }
   0xd   : > { %p154_p10 = pnand %p1821_p6, %p153_p9 }
   0xf   : > { %157 = sbr.rel (%p154_p10) target bundleno = 868 (0x364), region = 28 }
  0x14   : > { %p185_p11 = scmp.lt.s32.totalorder %s2050_s12, 1  ;;  %vm303_vm0 = vcmask 1046528   ;;  %s2060_s28 = smov 4   ;;  %vm384_vm1 = vcmask 1045504   ;;  %vm1259_vm2 = vcmask 31744   ;;  %vm1292_vm3 = vcmask 64512  }
  0x15   : > { %s2061_s29 = smov 8   ;;  %s2062_s30 = smov 12   ;;  %vm1325_vm4 = vcmask 97280   ;;  %vm1358_vm5 = vcmask 130048   ;;  %vm1391_vm6 = vcmask 162816   ;;  %vm1424_vm7 = vcmask 195584  }
  0x16   : > { %s186_s23 = scalar_select %p185_p11, %s2050_s12, 1  ;;  %vm1457_vm8 = vcmask 228352   ;;  %vm1490_vm9 = vcmask 261120   ;;  %vm1523_vm10 = vcmask 293888  }
  0x17   : > { %s2063_s3 = smov 16   ;;  %s2064_s4 = smov 20  }
  0x18   : > { %s1897_s24 = smul.u32 432, %s186_s23  ;;  %s2065_s5 = smov 24  }
  0x19   : > { %s2066_s6 = smov 28   ;;  %s2067_s7 = smov 32  }
  0x1a   : > { %s2144_s27 = scalar_lea.vmem %s3770_s0, %s1897_s24  ;;  %s180_s16 = sand.u32 1, %s2042_s10  }
  0x1b   : > { %v2147_v0 = vld [vmem:[%s2144_s27 + $0x18] sm:$0xff]  ;;  %v2150_v1 = vld [vmem:[%s2144_s27 + $0x20] sm:$0xff]  ;;  %v2158_v5 = vld [vmem:[%s2144_s27 + $0x8] sm:$0xff]  ;;  %s1822_s18 = sshll.u32 %s180_s16, 4  ;;  %s1862_s24 = sshll.u32 %s2050_s12, 8 }
  0x1c   : > { %v2153_v2 = vld [vmem:[%s2144_s27] sm:$0xff]  ;;  %v309_v3 = vrot.slane %v2147_v0, 1  ;;  %v310_v4 = vrot.slane %v2150_v1, 1  ;;  %v2162_v7 = vld [vmem:[%s2144_s27 + $0x28] sm:$0x3]  ;;  %v305_v8 = vrot.slane %v2158_v5, 1 }
  0x1d   : > { %v304_v6 = vrot.slane %v2153_v2, 1  ;;  %v312_v9 = vrot.slane %v2162_v7, 1  ;;  %v2167_v10 = vld [vmem:[%s2144_s27 + $0x10] sm:$0x3]  ;;  %v2170_v11 = vld [vmem:[%s2144_s27 + $0x38] sm:$0xff]  ;;  %v2200_v24 = vld [vmem:[%s2144_s27 + $0x48] sm:$0xff] }
  0x1e   : > { %v2173_v12 = vsel %vm303_vm0, %v309_v3, %v310_v4  ;;  %v307_v13 = vrot.slane %v2167_v10, 1  ;;  %v2177_v14 = vld [vmem:[%s2144_s27 + $0x40] sm:$0x3]  ;;  %v2180_v15 = vld [vmem:[%s2144_s27 + $0x30] sm:$0xff]  ;;  %v315_v18 = vrot.slane %v2170_v11, 1  ;;  %v319_v29 = vrot.slane %v2200_v24, 1 }
  0x1f   : > { %3881 = vst [vmem:[#allocation5_spill] sm:$0xff] %v2173_v12  ;;  %495 = vrot.lane.b32.xlu1 %v2173_v12, %s2060_s28  ;;  %v306_v16 = vsel %vm303_vm0, %v304_v6, %v305_v8  ;;  %v2187_v17 = vsel %vm303_vm0, %v310_v4, %v312_v9  ;;  %v317_v19 = vrot.slane %v2177_v14, 1  ;;  %v314_v21 = vrot.slane %v2180_v15, 1  ;;  %v2194_v22 = vld [vmem:[%s2144_s27 + $0x50] sm:$0xff]  ;;  %v2197_v23 = vld [vmem:[%s2144_s27 + $0x58] sm:$0x3] }
  0x20   : > { %491 = vrot.lane.b32.xlu0 %v306_v16, %s2060_s28  ;;  %3882 = vst [vmem:[#allocation6_spill] sm:$0xff] %v2187_v17  ;;  %v308_v20 = vsel %vm303_vm0, %v305_v8, %v307_v13  ;;  %v320_v26 = vrot.slane %v2194_v22, 1  ;;  %v322_v27 = vrot.slane %v2197_v23, 1  ;;  %v2215_v30 = vld [vmem:[%s2144_s27 + $0x68] sm:$0xff]  ;;  %v2218_v31 = vld [vmem:[%s2144_s27 + $0x70] sm:$0x3] }
  0x21   : > { %v2206_v25 = vsel %vm303_vm0, %v315_v18, %v317_v19  ;;  %v2211_v28 = vsel %vm303_vm0, %v314_v21, %v315_v18  ;;  %v2221_v32 = vld [vmem:[%s2144_s27 + $0x60] sm:$0xff]  ;;  %v325_v34 = vrot.slane %v2215_v30, 1  ;;  %v327_v35 = vrot.slane %v2218_v31, 1  ;;  %v2240_v39 = vld [vmem:[%s2144_s27 + $0x88] sm:$0x3]  ;;  %v2243_v40 = vld [vmem:[%s2144_s27 + $0x78] sm:$0xff] }
  0x22   : > { %3883 = vst [vmem:[#allocation7_spill] sm:$0xff] %v2206_v25  ;;  %3884 = vst [vmem:[#allocation8_spill] sm:$0xff] %v2211_v28  ;;  %v2228_v33 = vsel %vm303_vm0, %v320_v26, %v322_v27  ;;  %v2233_v36 = vsel %vm303_vm0, %v319_v29, %v320_v26  ;;  %v324_v37 = vrot.slane %v2221_v32, 1  ;;  %v2237_v38 = vld [vmem:[%s2144_s27 + $0x80] sm:$0xff]  ;;  %v332_v43 = vrot.slane %v2240_v39, 1  ;;  %v2259_v46 = vld [vmem:[%s2144_s27 + $0x98] sm:$0xff] }
  0x23   : > { %497 = vrot.lane.b32.xlu1 %v2187_v17, %s2060_s28  ;;  %3885 = vst [vmem:[#allocation9_spill] sm:$0xff] %v2228_v33  ;;  %3886 = vst [vmem:[#allocation10_spill] sm:$0xff] %v2233_v36  ;;  %v2250_v41 = vsel %vm303_vm0, %v325_v34, %v327_v35  ;;  %v330_v42 = vrot.slane %v2237_v38, 1  ;;  %v329_v45 = vrot.slane %v2243_v40, 1  ;;  %v2262_v47 = vld [vmem:[%s2144_s27 + $0xa0] sm:$0x3] }
  0x24   : > { %493 = vrot.lane.b32.xlu0 %v308_v20, %s2060_s28  ;;  %3887 = vst [vmem:[#allocation11_spill] sm:$0xff] %v2250_v41  ;;  %v2255_v44 = vsel %vm303_vm0, %v324_v37, %v325_v34  ;;  %v2265_v48 = vld [vmem:[%s2144_s27 + $0x90] sm:$0xff]  ;;  %v335_v50 = vrot.slane %v2259_v46, 1  ;;  %v337_v51 = vrot.slane %v2262_v47, 1  ;;  %v2284_v55 = vld [vmem:[%s2144_s27 + $0xb8] sm:$0x3] }
  0x25   : > { %3888 = vst [vmem:[#allocation12_spill] sm:$0xff] %v2255_v44  ;;  %v2272_v49 = vsel %vm303_vm0, %v330_v42, %v332_v43  ;;  %v2277_v52 = vsel %vm303_vm0, %v329_v45, %v330_v42  ;;  %v334_v53 = vrot.slane %v2265_v48, 1  ;;  %v2281_v54 = vld [vmem:[%s2144_s27 + $0xb0] sm:$0xff]  ;;  %v2287_v56 = vld [vmem:[%s2144_s27 + $0xa8] sm:$0xff]  ;;  %v342_v59 = vrot.slane %v2284_v55, 1  ;;  %v2309_v3 = vld [vmem:[%s2144_s27 + $0xc0] sm:$0xff] }
  0x26   : > { %3889 = vst [vmem:[#allocation13_spill] sm:$0xff] %v2272_v49  ;;  %3890 = vst [vmem:[#allocation14_spill] sm:$0xff] %v2277_v52  ;;  %v2294_v57 = vsel %vm303_vm0, %v335_v50, %v337_v51  ;;  %v340_v58 = vrot.slane %v2281_v54, 1  ;;  %v339_v61 = vrot.slane %v2287_v56, 1  ;;  %v2303_v62 = vld [vmem:[%s2144_s27 + $0xc8] sm:$0xff]  ;;  %v344_v13 = vrot.slane %v2309_v3, 1 }
  0x27   : > { %501 = vrot.lane.b32.xlu1 %v2206_v25, %s2060_s28  ;;  %3891 = vst [vmem:[#allocation15_spill] sm:$0xff] %v2281_v54  ;;  %3892 = vst [vmem:[#allocation16_spill] sm:$0xff] %v2287_v56  ;;  %v2299_v60 = vsel %vm303_vm0, %v334_v53, %v335_v50  ;;  %v2306_v63 = vld [vmem:[%s2144_s27 + $0xd0] sm:$0x3]  ;;  %v345_v6 = vrot.slane %v2303_v62, 1  ;;  %v2325_v16 = vld [vmem:[%s2144_s27 + $0xe0] sm:$0xff] }
  0x28   : > { %499 = vrot.lane.b32.xlu0 %v2211_v28, %s2060_s28  ;;  %3893 = vst [vmem:[#allocation17_spill] sm:$0xff] %v2294_v57  ;;  %3894 = vst [vmem:[#allocation18_spill] sm:$0xff] %v2299_v60  ;;  %v2316_v4 = vsel %vm303_vm0, %v340_v58, %v342_v59  ;;  %v347_v8 = vrot.slane %v2306_v63, 1  ;;  %v2321_v9 = vsel %vm303_vm0, %v339_v61, %v340_v58  ;;  %v2328_v18 = vld [vmem:[%s2144_s27 + $0xe8] sm:$0x3]  ;;  %v2331_v19 = vld [vmem:[%s2144_s27 + $0xd8] sm:$0xff] }
  0x29   : > { %3895 = vst [vmem:[#allocation19_spill] sm:$0xff] %v2316_v4  ;;  %3896 = vst [vmem:[#allocation20_spill] sm:$0xff] %v2321_v9  ;;  %v350_v21 = vrot.slane %v2325_v16, 1  ;;  %v352_v26 = vrot.slane %v2328_v18, 1  ;;  %v2343_v27 = vsel %vm303_vm0, %v344_v13, %v345_v6  ;;  %v349_v29 = vrot.slane %v2331_v19, 1  ;;  %v2347_v34 = vld [vmem:[%s2144_s27 + $0xf8] sm:$0xff] }
  0x2a   : > { %v2338_v20 = vsel %vm303_vm0, %v345_v6, %v347_v8  ;;  %v2350_v35 = vld [vmem:[%s2144_s27 + $0x100] sm:$0x3]  ;;  %v2353_v37 = vld [vmem:[%s2144_s27 + $0xf0] sm:$0xff]  ;;  %v355_v43 = vrot.slane %v2347_v34, 1  ;;  %v2372_v58 = vld [vmem:[%s2144_s27 + $0x118] sm:$0x3] }
  0x2b   : > { %505 = vrot.lane.b32.xlu1 %v2228_v33, %s2060_s28  ;;  %v2360_v42 = vsel %vm303_vm0, %v350_v21, %v352_v26  ;;  %v357_v45 = vrot.slane %v2350_v35, 1  ;;  %v2365_v50 = vsel %vm303_vm0, %v349_v29, %v350_v21  ;;  %v354_v51 = vrot.slane %v2353_v37, 1  ;;  %v2369_v53 = vld [vmem:[%s2144_s27 + $0x110] sm:$0xff]  ;;  %v2375_v59 = vld [vmem:[%s2144_s27 + $0x108] sm:$0xff]  ;;  %v2397_v12 = vld [vmem:[%s2144_s27 + $0x120] sm:$0xff]  ;;  %s182_s20 = scalar_lea.vmem [#allocation2], %s1822_s18 }
  0x2c   : > { %503 = vrot.lane.b32.xlu0 %v2233_v36, %s2060_s28  ;;  %3897 = vst [vmem:[#allocation21_spill] sm:$0xff] %v2365_v50  ;;  %v360_v6 = vrot.slane %v2369_v53, 1  ;;  %v362_v8 = vrot.slane %v2372_v58, 1  ;;  %v359_v21 = vrot.slane %v2375_v59, 1  ;;  %v2391_v26 = vld [vmem:[%s2144_s27 + $0x128] sm:$0xff]  ;;  %3900 = vst [vmem:[#allocation24_spill] sm:$0xff] %v2397_v12 }
  0x2d   : > { %v2382_v61 = vsel %vm303_vm0, %v355_v43, %v357_v45  ;;  %v2387_v13 = vsel %vm303_vm0, %v354_v51, %v355_v43  ;;  %v2394_v29 = vld [vmem:[%s2144_s27 + $0x130] sm:$0x3]  ;;  %v365_v43 = vrot.slane %v2391_v26, 1  ;;  %v364_v28 = vrot.slane %v2397_v12, 1  ;;  %v2413_v25 = vld [vmem:[%s2144_s27 + $0x140] sm:$0xff]  ;;  %s1715_s23 = sshll.u32 %s182_s20, 4  ;;  %s3727_s23 = int_to_ptr.vmem [resolvable:$true] %s1715_s23 }
  0x2e   : > { %3898 = vst [vmem:[#allocation22_spill] sm:$0xff] %v2382_v61  ;;  %3899 = vst [vmem:[#allocation23_spill] sm:$0xff] %v2387_v13  ;;  %v2404_v45 = vsel %vm303_vm0, %v360_v6, %v362_v8  ;;  %v367_v51 = vrot.slane %v2394_v29, 1  ;;  %v2409_v17 = vsel %vm303_vm0, %v359_v21, %v360_v6  ;;  %v370_v6 = vrot.slane %v2413_v25, 1  ;;  %s2068_s12 = smov [#allocation2]  }
  0x2f   : > { %509 = vrot.lane.b32.xlu1 %v2250_v41, %s2060_s28  ;;  %3901 = vst [vmem:[#allocation25_spill] sm:$0xff] %v2404_v45  ;;  %3902 = vst [vmem:[#allocation26_spill] sm:$0xff] %v2409_v17  ;;  %v2431_v36 = vsel %vm303_vm0, %v364_v28, %v365_v43 }
  0x30   : > { %507 = vrot.lane.b32.xlu0 %v2255_v44, %s2060_s28  ;;  %3903 = vst [vmem:[#allocation27_spill] sm:$0xff] %v2413_v25  ;;  %v2426_v8 = vsel %vm303_vm0, %v365_v43, %v367_v51  ;;  %3905 = vst [vmem:[#allocation29_spill] sm:$0xff] %v2431_v36  ;;  %v2435_v44 = vld [vmem:[%s2144_s27 + $0x158] sm:$0xff] }
  0x31   : > { %3904 = vst [vmem:[#allocation28_spill] sm:$0xff] %v2426_v8  ;;  %v375_v28 = vrot.slane %v2435_v44, 1 }
  0x33   : > { %513 = vrot.lane.b32.xlu1 %v2272_v49, %s2060_s28  ;;  %v2457_v49 = vld [vmem:[%s2144_s27 + $0x170] sm:$0xff] }
  0x34   : > { %511 = vrot.lane.b32.xlu0 %v2277_v52, %s2060_s28 }
  0x37   : > { %517 = vrot.lane.b32.xlu1 %v2294_v57, %s2060_s28 }
  0x38   : > { %515 = vrot.lane.b32.xlu0 %v2299_v60, %s2060_s28  ;;  %v2460_v60 = vld [vmem:[%s2144_s27 + $0x178] sm:$0x3] }
  0x3b   : > { %521 = vrot.lane.b32.xlu1 %v2316_v4, %s2060_s28 }
  0x3c   : > { %519 = vrot.lane.b32.xlu0 %v2321_v9, %s2060_s28 }
  0x3f   : > { %525 = vrot.lane.b32.xlu1 %v2338_v20, %s2060_s28 }
  0x40   : > { %523 = vrot.lane.b32.xlu0 %v2343_v27, %s2060_s28 }
  0x43   : > { %529 = vrot.lane.b32.xlu1 %v2360_v42, %s2060_s28 }
  0x44   : > { %527 = vrot.lane.b32.xlu0 %v2365_v50, %s2060_s28  ;;  %v2814_v50 = vld [vmem:[%s2144_s27 + $0x188] sm:$0xff] }
  0x47   : > { %533 = vrot.lane.b32.xlu1 %v2382_v61, %s2060_s28  ;;  %v2416_v61 = vld [vmem:[%s2144_s27 + $0x148] sm:$0x3] }
  0x48   : > { %531 = vrot.lane.b32.xlu0 %v2387_v13, %s2060_s28  ;;  %v2419_v13 = vld [vmem:[%s2144_s27 + $0x138] sm:$0xff]  ;;  %v372_v21 = vrot.slane %v2416_v61, 1 }
  0x49   : > { %v369_v33 = vrot.slane %v2419_v13, 1 }
  0x4a   : > { %v2448_v51 = vsel %vm303_vm0, %v370_v6, %v372_v21 }
  0x4b   : > { %537 = vrot.lane.b32.xlu1 %v2404_v45, %s2060_s28  ;;  %v2438_v45 = vld [vmem:[%s2144_s27 + $0x160] sm:$0x3]  ;;  %3906 = vst [vmem:[#allocation30_spill] sm:$0xff] %v2448_v51  ;;  %v2453_v41 = vsel %vm303_vm0, %v369_v33, %v370_v6  ;;  %v380_v33 = vrot.slane %v2457_v49, 1  ;;  %v382_v6 = vrot.slane %v2460_v60, 1 }
  0x4c   : > { %535 = vrot.lane.b32.xlu0 %v2409_v17, %s2060_s28  ;;  %v2441_v17 = vld [vmem:[%s2144_s27 + $0x150] sm:$0xff]  ;;  %v377_v43 = vrot.slane %v2438_v45, 1  ;;  %3907 = vst [vmem:[#allocation31_spill] sm:$0xff] %v2453_v41 }
  0x4d   : > { %v374_v52 = vrot.slane %v2441_v17, 1 }
  0x4e   : > { %v2470_v21 = vsel %vm303_vm0, %v375_v28, %v377_v43  ;;  %v386_v43 = vrot.slane %v2158_v5, 2 }
  0x4f   : > { %541 = vrot.lane.b32.xlu1 %v2426_v8, %s2060_s28  ;;  %v2463_v8 = vld [vmem:[%s2144_s27 + $0x168] sm:$0xff]  ;;  %3908 = vst [vmem:[#allocation32_spill] sm:$0xff] %v2470_v21 }
  0x50   : > { %539 = vrot.lane.b32.xlu0 %v2431_v36, %s2060_s28  ;;  %v2475_v36 = vsel %vm303_vm0, %v374_v52, %v375_v28  ;;  %v379_v57 = vrot.slane %v2463_v8, 1  ;;  %v385_v52 = vrot.slane %v2153_v2, 2 }
  0x51   : > { %3909 = vst [vmem:[#allocation33_spill] sm:$0xff] %v2475_v36 }
  0x52   : > { %v2488_v9 = vsel %vm303_vm0, %v379_v57, %v380_v33  ;;  %v390_v57 = vrot.slane %v2147_v0, 2 }
  0x53   : > { %545 = vrot.lane.b32.xlu1 %v2448_v51, %s2060_s28  ;;  %v388_v51 = vrot.slane %v2167_v10, 2  ;;  %3910 = vst [vmem:[#allocation34_spill] sm:$0xff] %v2488_v9  ;;  %v387_v10 = vsel %vm384_vm1, %v385_v52, %v386_v43  ;;  %v403_v52 = vrot.slane %v2197_v23, 2 }
  0x54   : > { %543 = vrot.lane.b32.xlu0 %v2453_v41, %s2060_s28  ;;  %v2483_v41 = vsel %vm303_vm0, %v380_v33, %v382_v6  ;;  %v391_v6 = vrot.slane %v2150_v1, 2 }
  0x55   : > { %v389_v28 = vsel %vm384_vm1, %v386_v43, %v388_v51  ;;  %v398_v51 = vrot.slane %v2177_v14, 2 }
  0x57   : > { %549 = vrot.lane.b32.xlu1 %v2470_v21, %s2060_s28  ;;  %v396_v21 = vrot.slane %v2170_v11, 2 }
  0x58   : > { %547 = vrot.lane.b32.xlu0 %v2475_v36, %s2060_s28  ;;  %v393_v36 = vrot.slane %v2162_v7, 2  ;;  %v395_v7 = vrot.slane %v2180_v15, 2 }
  0x59   : > { %v2516_v43 = vsel %vm384_vm1, %v396_v21, %v398_v51 }
  0x5a   : > { %v2503_v33 = vsel %vm384_vm1, %v391_v6, %v393_v36  ;;  %3913 = vst [vmem:[#allocation37_spill] sm:$0xff] %v2516_v43  ;;  %v401_v36 = vrot.slane %v2194_v22, 2  ;;  %v2521_v14 = vsel %vm384_vm1, %v395_v7, %v396_v21  ;;  %v405_v21 = vrot.slane %v2221_v32, 2 }
  0x5b   : > { %553 = vrot.lane.b32.xlu1 %v2483_v41, %s2060_s28  ;;  %3911 = vst [vmem:[#allocation35_spill] sm:$0xff] %v2503_v33  ;;  %3914 = vst [vmem:[#allocation38_spill] sm:$0xff] %v2521_v14  ;;  %v411_v7 = vrot.slane %v2237_v38, 2 }
  0x5c   : > { %551 = vrot.lane.b32.xlu0 %v2488_v9, %s2060_s28  ;;  %v2508_v9 = vsel %vm384_vm1, %v390_v57, %v391_v6  ;;  %v2529_v6 = vsel %vm384_vm1, %v401_v36, %v403_v52  ;;  %v408_v57 = vrot.slane %v2218_v31, 2  ;;  %v413_v52 = vrot.slane %v2240_v39, 2  ;;  %s1697_s28 = scalar_lea.sflag [#allocation3], %s180_s16 }
  0x5d   : > { %3912 = vst [vmem:[#allocation36_spill] sm:$0xff] %v2508_v9  ;;  %3915 = vst [vmem:[#allocation39_spill] sm:$0xff] %v2529_v6 }
  0x5f   : > { %589 = vrot.lane.b32.xlu1 %v389_v28, %s2061_s29  ;;  %v400_v28 = vrot.slane %v2200_v24, 2 }
  0x60   : > { %587 = vrot.lane.b32.xlu0 %v387_v10, %s2061_s29  ;;  %v406_v10 = vrot.slane %v2215_v30, 2 }
  0x61   : > { %v2534_v23 = vsel %vm384_vm1, %v400_v28, %v401_v36  ;;  %v410_v36 = vrot.slane %v2243_v40, 2  ;;  %v2555_v28 = vsel %vm384_vm1, %v411_v7, %v413_v52  ;;  %v421_v52 = vrot.slane %v2281_v54, 2 }
  0x62   : > { %3916 = vst [vmem:[#allocation40_spill] sm:$0xff] %v2534_v23  ;;  %v2542_v51 = vsel %vm384_vm1, %v406_v10, %v408_v57  ;;  %v2547_v31 = vsel %vm384_vm1, %v405_v21, %v406_v10  ;;  %3919 = vst [vmem:[#allocation43_spill] sm:$0xff] %v2555_v28  ;;  %v416_v57 = vrot.slane %v2259_v46, 2  ;;  %v415_v10 = vrot.slane %v2265_v48, 2 }
  0x63   : > { %593 = vrot.lane.b32.xlu1 %v2503_v33, %s2061_s29  ;;  %3917 = vst [vmem:[#allocation41_spill] sm:$0xff] %v2542_v51  ;;  %3918 = vst [vmem:[#allocation42_spill] sm:$0xff] %v2547_v31  ;;  %v2560_v39 = vsel %vm384_vm1, %v410_v36, %v411_v7  ;;  %v423_v33 = vrot.slane %v2284_v55, 2  ;;  %v420_v7 = vrot.slane %v2287_v56, 2 }
  0x64   : > { %591 = vrot.lane.b32.xlu0 %v2508_v9, %s2061_s29  ;;  %v418_v9 = vrot.slane %v2262_v47, 2  ;;  %3920 = vst [vmem:[#allocation44_spill] sm:$0xff] %v2560_v39  ;;  %v2573_v47 = vsel %vm384_vm1, %v415_v10, %v416_v57 }
  0x65   : > { %3922 = vst [vmem:[#allocation46_spill] sm:$0xff] %v2573_v47  ;;  %v2581_v36 = vsel %vm384_vm1, %v421_v52, %v423_v33  ;;  %v2586_v55 = vsel %vm384_vm1, %v420_v7, %v421_v52  ;;  %v431_v33 = vrot.slane %v2325_v16, 2  ;;  %v430_v52 = vrot.slane %v2331_v19, 2 }
  0x66   : > { %v2568_v21 = vsel %vm384_vm1, %v416_v57, %v418_v9  ;;  %3923 = vst [vmem:[#allocation47_spill] sm:$0xff] %v2581_v36  ;;  %v426_v9 = vrot.slane %v2303_v62, 2  ;;  %3924 = vst [vmem:[#allocation48_spill] sm:$0xff] %v2586_v55  ;;  %v425_v57 = vrot.slane %v2309_v3, 2 }
  0x67   : > { %597 = vrot.lane.b32.xlu1 %v2516_v43, %s2061_s29  ;;  %3921 = vst [vmem:[#allocation45_spill] sm:$0xff] %v2568_v21  ;;  %v433_v43 = vrot.slane %v2328_v18, 2  ;;  %v2612_v18 = vsel %vm384_vm1, %v430_v52, %v431_v33 }
  0x68   : > { %595 = vrot.lane.b32.xlu0 %v2521_v14, %s2061_s29  ;;  %v428_v14 = vrot.slane %v2306_v63, 2  ;;  %v2599_v63 = vsel %vm384_vm1, %v425_v57, %v426_v9  ;;  %3925 = vst [vmem:[#allocation49_spill] sm:$0xff] %v2612_v18 }
  0x69   : > { %v2607_v7 = vsel %vm384_vm1, %v431_v33, %v433_v43  ;;  %v441_v43 = vrot.slane %v2369_v53, 2  ;;  %v440_v33 = vrot.slane %v2375_v59, 2 }
  0x6a   : > { %v2594_v10 = vsel %vm384_vm1, %v426_v9, %v428_v14  ;;  %v436_v14 = vrot.slane %v2347_v34, 2  ;;  %v435_v9 = vrot.slane %v2353_v37, 2 }
  0x6b   : > { %601 = vrot.lane.b32.xlu1 %v2529_v6, %s2061_s29  ;;  %v443_v6 = vrot.slane %v2372_v58, 2  ;;  %v2638_v58 = vsel %vm384_vm1, %v440_v33, %v441_v43 }
  0x6c   : > { %599 = vrot.lane.b32.xlu0 %v2534_v23, %s2061_s29  ;;  %v438_v23 = vrot.slane %v2350_v35, 2  ;;  %v2625_v35 = vsel %vm384_vm1, %v435_v9, %v436_v14  ;;  %3929 = vst [vmem:[#allocation53_spill] sm:$0xff] %v2638_v58 }
  0x6d   : > { %3927 = vst [vmem:[#allocation51_spill] sm:$0xff] %v2625_v35  ;;  %v2633_v52 = vsel %vm384_vm1, %v441_v43, %v443_v6  ;;  %v451_v6 = vrot.slane %v2413_v25, 2  ;;  %v450_v43 = vrot.slane %v2419_v13, 2 }
  0x6e   : > { %v2620_v57 = vsel %vm384_vm1, %v436_v14, %v438_v23  ;;  %3928 = vst [vmem:[#allocation52_spill] sm:$0xff] %v2633_v52  ;;  %v446_v23 = vrot.slane %v2391_v26, 2  ;;  %v445_v14 = vrot.slane %v2397_v12, 2 }
  0x6f   : > { %605 = vrot.lane.b32.xlu1 %v2542_v51, %s2061_s29  ;;  %3926 = vst [vmem:[#allocation50_spill] sm:$0xff] %v2620_v57 }
  0x70   : > { %603 = vrot.lane.b32.xlu0 %v2547_v31, %s2061_s29  ;;  %v448_v31 = vrot.slane %v2394_v29, 2  ;;  %v2651_v29 = vsel %vm384_vm1, %v445_v14, %v446_v23 }
  0x71   : > { %3931 = vst [vmem:[#allocation55_spill] sm:$0xff] %v2651_v29 }
  0x72   : > { %v2646_v9 = vsel %vm384_vm1, %v446_v23, %v448_v31  ;;  %v456_v31 = vrot.slane %v2435_v44, 2  ;;  %v455_v23 = vrot.slane %v2441_v17, 2 }
  0x73   : > { %609 = vrot.lane.b32.xlu1 %v2555_v28, %s2061_s29  ;;  %3930 = vst [vmem:[#allocation54_spill] sm:$0xff] %v2646_v9 }
  0x74   : > { %607 = vrot.lane.b32.xlu0 %v2560_v39, %s2061_s29 }
  0x77   : > { %613 = vrot.lane.b32.xlu1 %v2568_v21, %s2061_s29 }
  0x78   : > { %611 = vrot.lane.b32.xlu0 %v2573_v47, %s2061_s29 }
  0x7b   : > { %617 = vrot.lane.b32.xlu1 %v2581_v36, %s2061_s29 }
  0x7c   : > { %615 = vrot.lane.b32.xlu0 %v2586_v55, %s2061_s29 }
  0x7f   : > { %621 = vrot.lane.b32.xlu1 %v2594_v10, %s2061_s29 }
  0x80   : > { %619 = vrot.lane.b32.xlu0 %v2599_v63, %s2061_s29 }
  0x83   : > { %625 = vrot.lane.b32.xlu1 %v2607_v7, %s2061_s29 }
  0x84   : > { %623 = vrot.lane.b32.xlu0 %v2612_v18, %s2061_s29 }
  0x87   : > { %629 = vrot.lane.b32.xlu1 %v2620_v57, %s2061_s29  ;;  %v458_v57 = vrot.slane %v2438_v45, 2  ;;  %v461_v45 = vrot.slane %v2457_v49, 2 }
  0x88   : > { %627 = vrot.lane.b32.xlu0 %v2625_v35, %s2061_s29  ;;  %v453_v35 = vrot.slane %v2416_v61, 2  ;;  %v2666_v61 = vsel %vm384_vm1, %v450_v43, %v451_v6  ;;  %v460_v43 = vrot.slane %v2463_v8, 2 }
  0x89   : > { %3933 = vst [vmem:[#allocation57_spill] sm:$0xff] %v2666_v61 }
  0x8a   : > { %v2659_v33 = vsel %vm384_vm1, %v451_v6, %v453_v35  ;;  %v2676_v35 = vsel %vm384_vm1, %v456_v31, %v458_v57  ;;  %v2683_v6 = vsel %vm384_vm1, %v455_v23, %v456_v31 }
  0x8b   : > { %633 = vrot.lane.b32.xlu1 %v2633_v52, %s2061_s29  ;;  %3932 = vst [vmem:[#allocation56_spill] sm:$0xff] %v2659_v33  ;;  %3934 = vst [vmem:[#allocation58_spill] sm:$0xff] %v2676_v35  ;;  %v463_v52 = vrot.slane %v2460_v60, 2  ;;  %v2698_v60 = vsel %vm384_vm1, %v460_v43, %v461_v45 }
  0x8c   : > { %631 = vrot.lane.b32.xlu0 %v2638_v58, %s2061_s29  ;;  %3935 = vst [vmem:[#allocation59_spill] sm:$0xff] %v2683_v6  ;;  %3937 = vst [vmem:[#allocation61_spill] sm:$0xff] %v2698_v60 }
  0x8d   : > { %v2693_v57 = vsel %vm384_vm1, %v461_v45, %v463_v52 }
  0x8e   : > { %3936 = vst [vmem:[#allocation60_spill] sm:$0xff] %v2693_v57 }
  0x8f   : > { %637 = vrot.lane.b32.xlu1 %v2646_v9, %s2061_s29 }
  0x90   : > { %635 = vrot.lane.b32.xlu0 %v2651_v29, %s2061_s29 }
  0x91   : > { %v2663_v58 = vpop.permute.xlu1 %495 }
  0x92   : > { %v2669_v14 = vpop.permute.xlu0 %491 }
  0x93   : > { %641 = vrot.lane.b32.xlu1 %v2659_v33, %s2061_s29 }
  0x94   : > { %639 = vrot.lane.b32.xlu0 %v2666_v61, %s2061_s29 }
  0x95   : > { %v2680_v29 = vpop.permute.xlu1 %497 }
  0x96   : > { %v2686_v51 = vpop.permute.xlu0 %493 }
  0x97   : > { %645 = vrot.lane.b32.xlu1 %v2676_v35, %s2061_s29 }
  0x98   : > { %643 = vrot.lane.b32.xlu0 %v2683_v6, %s2061_s29 }
  0x99   : > { %v2695_v9 = vpop.permute.xlu1 %501 }
  0x9a   : > { %v2700_v31 = vpop.permute.xlu0 %499 }
  0x9b   : > { %649 = vrot.lane.b32.xlu1 %v2693_v57, %s2061_s29 }
  0x9c   : > { %647 = vrot.lane.b32.xlu0 %v2698_v60, %s2061_s29  ;;  %s1982_s29 = scalar_lea.vmem %s3727_s23, 256 }
  0x9d   : > { %v2706_v23 = vpop.permute.xlu1 %505  ;;  %p1983_p12 = scmp.ne.s32.totalorder %s3727_s23, %s1982_s29 }
  0x9e   : > { %v2708_v39 = vpop.permute.xlu0 %503 }
  0x9f   : > { %685 = vrot.lane.b32.xlu1 %v2150_v1, %s2062_s30  ;;  %p1984_p13 = pnand %p1983_p12, %p2124_p4 }
  0xa0   : > { %683 = vrot.lane.b32.xlu0 %v2147_v0, %s2062_s30 }
  0xa1   : > { %v2714_v52 = vpop.permute.xlu1 %509  ;;  %p1985_p0 = pneg %p1984_p13 }
  0xa2   : > { %v2716_v45 = vpop.permute.xlu0 %507 }
  0xa3   : > { %689 = vrot.lane.b32.xlu1 %v2170_v11, %s2062_s30 }
  0xa4   : > { %687 = vrot.lane.b32.xlu0 %v2180_v15, %s2062_s30 }
  0xa5   : > { %v2722_v43 = vpop.permute.xlu1 %513 }
  0xa6   : > { %v2724_v61 = vpop.permute.xlu0 %511 }
  0xa7   : > { %693 = vrot.lane.b32.xlu1 %v2194_v22, %s2062_s30 }
  0xa8   : > { %691 = vrot.lane.b32.xlu0 %v2200_v24, %s2062_s30 }
  0xa9   : > { %v2730_v28 = vpop.permute.xlu1 %517 }
  0xaa   : > { %3938 = vst [vmem:[#allocation62_spill] sm:$0xff] %v2730_v28  ;;  %v2732_v33 = vpop.permute.xlu0 %515 }
  0xab   : > { %697 = vrot.lane.b32.xlu1 %v2215_v30, %s2062_s30 }
  0xac   : > { %695 = vrot.lane.b32.xlu0 %v2221_v32, %s2062_s30 }
  0xad   : > { %v2738_v47 = vpop.permute.xlu1 %521 }
  0xae   : > { %3939 = vst [vmem:[#allocation63_spill] sm:$0xff] %v2738_v47  ;;  %v2740_v6 = vpop.permute.xlu0 %519 }
  0xaf   : > { %3940 = vst [vmem:[#allocation64_spill] sm:$0xff] %v2740_v6  ;;  %701 = vrot.lane.b32.xlu1 %v2237_v38, %s2062_s30 }
  0xb0   : > { %699 = vrot.lane.b32.xlu0 %v2243_v40, %s2062_s30 }
  0xb1   : > { %v2746_v21 = vpop.permute.xlu1 %525 }
  0xb2   : > { %v2748_v28 = vpop.permute.xlu0 %523 }
  0xb3   : > { %705 = vrot.lane.b32.xlu1 %v2259_v46, %s2062_s30 }
  0xb4   : > { %703 = vrot.lane.b32.xlu0 %v2265_v48, %s2062_s30 }
  0xb5   : > { %v2754_v35 = vpop.permute.xlu1 %529 }
  0xb6   : > { %v2756_v47 = vpop.permute.xlu0 %527 }
  0xb7   : > { %709 = vrot.lane.b32.xlu1 %v2281_v54, %s2062_s30 }
  0xb8   : > { %707 = vrot.lane.b32.xlu0 %v2287_v56, %s2062_s30 }
  0xb9   : > { %v2762_v6 = vpop.permute.xlu1 %533 }
  0xba   : > { %v2764_v55 = vpop.permute.xlu0 %531 }
  0xbb   : > { %713 = vrot.lane.b32.xlu1 %v2303_v62, %s2062_s30 }
  0xbc   : > { %711 = vrot.lane.b32.xlu0 %v2309_v3, %s2062_s30 }
  0xbd   : > { %v2770_v46 = vpop.permute.xlu1 %537 }
  0xbe   : > { %v2772_v60 = vpop.permute.xlu0 %535 }
  0xbf   : > { %717 = vrot.lane.b32.xlu1 %v2325_v16, %s2062_s30 }
  0xc0   : > { %715 = vrot.lane.b32.xlu0 %v2331_v19, %s2062_s30 }
  0xc1   : > { %v2778_v56 = vpop.permute.xlu1 %541 }
  0xc2   : > { %v2780_v54 = vpop.permute.xlu0 %539 }
  0xc3   : > { %3941 = vst [vmem:[#allocation65_spill] sm:$0xff] %v2780_v54  ;;  %721 = vrot.lane.b32.xlu1 %v2347_v34, %s2062_s30 }
  0xc4   : > { %719 = vrot.lane.b32.xlu0 %v2353_v37, %s2062_s30 }
  0xc5   : > { %v2786_v18 = vpop.permute.xlu1 %545 }
  0xc6   : > { %3942 = vst [vmem:[#allocation66_spill] sm:$0xff] %v2786_v18  ;;  %v2788_v36 = vpop.permute.xlu0 %543 }
  0xc7   : > { %3943 = vst [vmem:[#allocation67_spill] sm:$0xff] %v2788_v36  ;;  %725 = vrot.lane.b32.xlu1 %v2369_v53, %s2062_s30 }
  0xc8   : > { %723 = vrot.lane.b32.xlu0 %v2375_v59, %s2062_s30 }
  0xc9   : > { %v2794_v4 = vpop.permute.xlu1 %549 }
  0xca   : > { %3944 = vst [vmem:[#allocation68_spill] sm:$0xff] %v2794_v4  ;;  %v2796_v57 = vpop.permute.xlu0 %547 }
  0xcb   : > { %3945 = vst [vmem:[#allocation69_spill] sm:$0xff] %v2796_v57  ;;  %729 = vrot.lane.b32.xlu1 %v2391_v26, %s2062_s30  ;;  %v1261_v57 = vsel %vm1259_vm2, %v2158_v5, %v2686_v51  ;;  %v469_v5 = vrot.slane %v2814_v50, 1 }
  0xcc   : > { %727 = vrot.lane.b32.xlu0 %v2397_v12, %s2062_s30  ;;  %v250_v12 = vld [vmem:[%s2144_s27 + $0x190] sm:$0x3] }
  0xcd   : > { %v2802_v18 = vpop.permute.xlu1 %553  ;;  %v471_v51 = vrot.slane %v250_v12, 1 }
  0xce   : > { %3946 = vst [vmem:[#allocation70_spill] sm:$0xff] %v2802_v18  ;;  %v2804_v36 = vpop.permute.xlu0 %551 }
  0xcf   : > { %3947 = vst [vmem:[#allocation71_spill] sm:$0xff] %v2804_v36  ;;  %733 = vrot.lane.b32.xlu1 %v2413_v25, %s2062_s30  ;;  %v1260_v36 = vsel %vm1259_vm2, %v2153_v2, %v2669_v14  ;;  %v1263_v2 = vsel %vm1259_vm2, %v2150_v1, %v2680_v29  ;;  %v2848_v1 = vsel %vm303_vm0, %v469_v5, %v471_v51  ;;  %v474_v29 = vrot.slane %v2814_v50, 2 }
  0xd0   : > { %731 = vrot.lane.b32.xlu0 %v2419_v13, %s2062_s30 }
  0xd1   : > { %v590_v4 = vpop.permute.xlu1 %589 }
  0xd2   : > { %v2821_v18 = vsel %vm1292_vm3, %v1261_v57, %v590_v4  ;;  %v588_v25 = vpop.permute.xlu0 %587  ;;  %v1262_v4 = vsel %vm1259_vm2, %v2147_v0, %v2663_v58  ;;  %v1265_v0 = vsel %vm1259_vm2, %v2170_v11, %v2695_v9  ;;  %v1266_v9 = vsel %vm1259_vm2, %v2200_v24, %v2708_v39  ;;  %v2895_v39 = vld [vmem:[%s2144_s27 + $0x180] sm:$0xff] }
  0xd3   : > { %3948 = vst [vmem:[#allocation72_spill] sm:$0xff] %v2821_v18  ;;  %v2824_v54 = vsel %vm1292_vm3, %v1260_v36, %v588_v25  ;;  %737 = vrot.lane.b32.xlu1 %v2435_v44, %s2062_s30  ;;  %v1269_v24 = vsel %vm1259_vm2, %v2215_v30, %v2714_v52  ;;  %v468_v30 = vrot.slane %v2895_v39, 1  ;;  %v3986_v18 = vld [vmem:[#allocation32_spill] sm:$0xff] }
  0xd4   : > { %3949 = vst [vmem:[#allocation73_spill] sm:$0xff] %v2824_v54  ;;  %735 = vrot.lane.b32.xlu0 %v2441_v17, %s2062_s30  ;;  %v476_v54 = vrot.slane %v250_v12, 2  ;;  %v1267_v12 = vsel %vm1259_vm2, %v2194_v22, %v2706_v23  ;;  %v2889_v22 = vld [vmem:[%s2144_s27 + $0x1a0] sm:$0xff]  ;;  %v1268_v23 = vsel %vm1259_vm2, %v2221_v32, %v2716_v45  ;;  %v1271_v32 = vsel %vm1259_vm2, %v2237_v38, %v2722_v43 }
  0xd5   : > { %v594_v14 = vpop.permute.xlu1 %593  ;;  %v482_v52 = vrot.slane %v2889_v22, 1  ;;  %v487_v38 = vrot.slane %v2889_v22, 2  ;;  %v2931_v43 = vsel %vm303_vm0, %v468_v30, %v469_v5 }
  0xd6   : > { %v2838_v25 = vsel %vm1292_vm3, %v1263_v2, %v594_v14  ;;  %v592_v36 = vpop.permute.xlu0 %591  ;;  %v1264_v2 = vsel %vm1259_vm2, %v2180_v15, %v2700_v31  ;;  %v2870_v11 = vsel %vm384_vm1, %v474_v29, %v476_v54 }
  0xd7   : > { %3950 = vst [vmem:[#allocation74_spill] sm:$0xff] %v2838_v25  ;;  %v2841_v57 = vsel %vm1292_vm3, %v1262_v4, %v592_v36  ;;  %741 = vrot.lane.b32.xlu1 %v2457_v49, %s2062_s30  ;;  %v3994_v25 = vld [vmem:[#allocation15_spill] sm:$0xff] }
  0xd8   : > { %3951 = vst [vmem:[#allocation75_spill] sm:$0xff] %v2841_v57  ;;  %739 = vrot.lane.b32.xlu0 %v2463_v8, %s2062_s30  ;;  %v3988_v57 = vld [vmem:[#allocation17_spill] sm:$0xff] }
  0xd9   : > { %v598_v58 = vpop.permute.xlu1 %597 }
  0xda   : > { %v2858_v14 = vsel %vm1292_vm3, %v1265_v0, %v598_v58  ;;  %v596_v4 = vpop.permute.xlu0 %595 }
  0xdb   : > { %3952 = vst [vmem:[#allocation76_spill] sm:$0xff] %v2858_v14  ;;  %v2861_v51 = vsel %vm1292_vm3, %v1264_v2, %v596_v4  ;;  %841 = vrot.lane.b32.xlu1 %v2848_v1, %s2063_s3  ;;  %v253_v4 = vld [vmem:[%s2144_s27 + $0x1a8] sm:$0x3] }
  0xdc   : > { %3953 = vst [vmem:[#allocation77_spill] sm:$0xff] %v2861_v51  ;;  %745 = vrot.lane.b32.xlu0 %v2814_v50, %s2062_s30  ;;  %v4001_v51 = vld [vmem:[#allocation18_spill] sm:$0xff] }
  0xdd   : > { %v602_v15 = vpop.permute.xlu1 %601 }
  0xde   : > { %v2879_v31 = vsel %vm1292_vm3, %v1267_v12, %v602_v15  ;;  %v600_v36 = vpop.permute.xlu0 %599  ;;  %v484_v15 = vrot.slane %v253_v4, 1 }
  0xdf   : > { %3954 = vst [vmem:[#allocation78_spill] sm:$0xff] %v2879_v31  ;;  %v2882_v0 = vsel %vm1292_vm3, %v1266_v9, %v600_v36  ;;  %937 = vrot.lane.b32.xlu1 %v2870_v11, %s2064_s4  ;;  %v1270_v9 = vsel %vm1259_vm2, %v2243_v40, %v2724_v61 }
  0xe0   : > { %3955 = vst [vmem:[#allocation79_spill] sm:$0xff] %v2882_v0  ;;  %809 = vrot.lane.b32.xlu0 %v2338_v20, %s2063_s3  ;;  %v485_v61 = vsel %vm303_vm0, %v482_v52, %v484_v15 }
  0xe1   : > { %v606_v54 = vpop.permute.xlu1 %605 }
  0xe2   : > { %v2901_v58 = vsel %vm1292_vm3, %v1269_v24, %v606_v54  ;;  %v604_v2 = vpop.permute.xlu0 %603 }
  0xe3   : > { %v2905_v12 = vsel %vm1292_vm3, %v1268_v23, %v604_v2  ;;  %1033 = vrot.lane.b32.xlu1 %v2889_v22, %s2065_s5  ;;  %v489_v23 = vrot.slane %v253_v4, 2  ;;  %v1272_v2 = vsel %vm1259_vm2, %v2265_v48, %v2732_v33  ;;  %v473_v22 = vrot.slane %v2895_v39, 2 }
  0xe4   : > { %905 = vrot.lane.b32.xlu0 %v2594_v10, %s2064_s4  ;;  %v1277_v33 = vsel %vm1259_vm2, %v2303_v62, %v2746_v21  ;;  %v1279_v21 = vsel %vm1259_vm2, %v2325_v16, %v2754_v35 }
  0xe5   : > { %v610_v45 = vpop.permute.xlu1 %609  ;;  %v490_v5 = vsel %vm384_vm1, %v487_v38, %v489_v23  ;;  %v2957_v48 = vsel %vm384_vm1, %v473_v22, %v474_v29  ;;  %v251_v22 = vld [vmem:[%s2144_s27 + $0x198] sm:$0xff] }
  0xe6   : > { %v2920_v36 = vsel %vm1292_vm3, %v1271_v32, %v610_v45  ;;  %v608_v24 = vpop.permute.xlu0 %607 }
  0xe7   : > { %v2923_v54 = vsel %vm1292_vm3, %v1270_v9, %v608_v24  ;;  %1001 = vrot.lane.b32.xlu1 %v2325_v16, %s2065_s5  ;;  %v1276_v9 = vsel %vm1259_vm2, %v2309_v3, %v2748_v28  ;;  %v1278_v28 = vsel %vm1259_vm2, %v2331_v19, %v2756_v47  ;;  %v1281_v16 = vsel %vm1259_vm2, %v2347_v34, %v2762_v6 }
  0xe8   : > { %743 = vrot.lane.b32.xlu0 %v2895_v39, %s2062_s30  ;;  %v481_v47 = vrot.slane %v251_v22, 1  ;;  %v1283_v34 = vsel %vm1259_vm2, %v2369_v53, %v2770_v46  ;;  %v1285_v46 = vsel %vm1259_vm2, %v2391_v26, %v2778_v56  ;;  %s1986_s30 = sshll.u32 %s2068_s12, 4  ;;  %s1987_s30 = int_to_ptr.vmem [resolvable:$false] %s1986_s30 }
  0xe9   : > { %v2933_v40 = vpop.permute.xlu1 %613  ;;  %p1989_p1 = scmp.lt.s32.totalorder %s3727_s23, %s1987_s30 }
  0xea   : > { %v612_v32 = vpop.permute.xlu0 %611 }
  0xeb   : > { %v2940_v45 = vsel %vm1292_vm3, %v1272_v2, %v612_v32  ;;  %839 = vrot.lane.b32.xlu1 %v2931_v43, %s2063_s3 }
  0xec   : > { %1129 = vrot.lane.b32.xlu0 %v485_v61, %s2066_s6 }
  0xed   : > { %v2947_v4 = vpop.permute.xlu1 %617 }
  0xee   : > { %v2949_v30 = vpop.permute.xlu0 %615 }
  0xef   : > { %1225 = vrot.lane.b32.xlu1 %v490_v5, %s2067_s7 }
  0xf0   : > { %1097 = vrot.lane.b32.xlu0 %v2360_v42, %s2066_s6 }
  0xf1   : > { %v622_v15 = vpop.permute.xlu1 %621 }
  0xf2   : > { %v2966_v24 = vsel %vm1292_vm3, %v1277_v33, %v622_v15  ;;  %v620_v23 = vpop.permute.xlu0 %619  ;;  %v1280_v33 = vsel %vm1259_vm2, %v2353_v37, %v2764_v55  ;;  %v483_v37 = vsel %vm303_vm0, %v481_v47, %v482_v52  ;;  %v1282_v55 = vsel %vm1259_vm2, %v2375_v59, %v2772_v60  ;;  %v3964_v59 = vld [vmem:[#allocation65_spill] sm:$0xff]  ;;  %v3965_v60 = vld [vmem:[#allocation24_spill] sm:$0xff]  ;;  %v3967_v47 = vld [vmem:[#allocation66_spill] sm:$0xff] }
  0xf3   : > { %3956 = vst [vmem:[#allocation80_spill] sm:$0xff] %v2966_v24  ;;  %v2969_v61 = vsel %vm1292_vm3, %v1276_v9, %v620_v23  ;;  %935 = vrot.lane.b32.xlu1 %v2957_v48, %s2064_s4  ;;  %v3987_v24 = vld [vmem:[#allocation58_spill] sm:$0xff] }
  0xf4   : > { %3957 = vst [vmem:[#allocation81_spill] sm:$0xff] %v2969_v61  ;;  %807 = vrot.lane.b32.xlu0 %v2343_v27, %s2063_s3 }
  0xf5   : > { %v626_v29 = vpop.permute.xlu1 %625 }
  0xf6   : > { %v2982_v2 = vsel %vm1292_vm3, %v1279_v21, %v626_v29  ;;  %v624_v32 = vpop.permute.xlu0 %623  ;;  %v486_v21 = vrot.slane %v251_v22, 2 }
  0xf7   : > { %3958 = vst [vmem:[#allocation82_spill] sm:$0xff] %v2982_v2  ;;  %v2986_v5 = vsel %vm1292_vm3, %v1278_v28, %v624_v32  ;;  %903 = vrot.lane.b32.xlu1 %v2599_v63, %s2064_s4  ;;  %v1284_v32 = vsel %vm1259_vm2, %v3965_v60, %v3964_v59 }
  0xf8   : > { %3959 = vst [vmem:[#allocation83_spill] sm:$0xff] %v2986_v5  ;;  %1193 = vrot.lane.b32.xlu0 %v2607_v7, %s2067_s7  ;;  %v488_v53 = vsel %vm384_vm1, %v486_v21, %v487_v38  ;;  %v3966_v38 = vld [vmem:[#allocation21_spill] sm:$0xff] }
  0xf9   : > { %v630_v35 = vpop.permute.xlu1 %629  ;;  %v3991_v5 = vld [vmem:[#allocation45_spill] sm:$0xff] }
  0xfa   : > { %v2999_v15 = vsel %vm1292_vm3, %v1281_v16, %v630_v35  ;;  %v628_v9 = vpop.permute.xlu0 %627 }
  0xfb   : > { %3960 = vst [vmem:[#allocation84_spill] sm:$0xff] %v2999_v15  ;;  %v3002_v23 = vsel %vm1292_vm3, %v1280_v33, %v628_v9  ;;  %999 = vrot.lane.b32.xlu1 %v2331_v19, %s2065_s5  ;;  %v3968_v33 = vld [vmem:[#allocation27_spill] sm:$0xff]  ;;  %v4004_v15 = vld [vmem:[#allocation30_spill] sm:$0xff] }
  0xfc   : > { %3961 = vst [vmem:[#allocation85_spill] sm:$0xff] %v3002_v23  ;;  %1031 = vrot.lane.b32.xlu0 %v251_v22, %s2065_s5  ;;  %v1287_v56 = vsel %vm1259_vm2, %v3968_v33, %v3967_v47  ;;  %v3969_v9 = vld [vmem:[#allocation67_spill] sm:$0xff]  ;;  %v3976_v47 = vld [vmem:[#allocation34_spill] sm:$0xff] }
  0xfd   : > { %v634_v6 = vpop.permute.xlu1 %633  ;;  %v1286_v21 = vsel %vm1259_vm2, %v2419_v13, %v3969_v9  ;;  %v3973_v13 = vld [vmem:[#allocation49_spill] sm:$0xff]  ;;  %v3982_v9 = vld [vmem:[#allocation20_spill] sm:$0xff]  ;;  %v4002_v23 = vld [vmem:[#allocation46_spill] sm:$0xff] }
  0xfe   : > { %v3015_v29 = vsel %vm1292_vm3, %v1283_v34, %v634_v6  ;;  %v632_v28 = vpop.permute.xlu0 %631 }
  0xff   : > { %3962 = vst [vmem:[#allocation86_spill] sm:$0xff] %v3015_v29  ;;  %v3018_v19 = vsel %vm1292_vm3, %v1282_v55, %v632_v28  ;;  %837 = vrot.lane.b32.xlu1 %v2483_v41, %s2063_s3  ;;  %v3970_v55 = vld [vmem:[#allocation60_spill] sm:$0xff]  ;;  %v3971_v28 = vld [vmem:[#allocation19_spill] sm:$0xff] }
 0x100   : > { %3963 = vst [vmem:[#allocation87_spill] sm:$0xff] %v3018_v19  ;;  %1127 = vrot.lane.b32.xlu0 %v483_v37, %s2066_s6  ;;  %v4006_v19 = vld [vmem:[#allocation13_spill] sm:$0xff]  ;;  %v4010_v29 = vld [vmem:[#allocation63_spill] sm:$0xff] }
 0x101   : > { %v638_v52 = vpop.permute.xlu1 %637 }
 0x102   : > { %v3031_v22 = vsel %vm1292_vm3, %v1285_v46, %v638_v52  ;;  %v636_v16 = vpop.permute.xlu0 %635  ;;  %v3972_v52 = vld [vmem:[#allocation47_spill] sm:$0xff] }
 0x103   : > { %v3034_v35 = vsel %vm1292_vm3, %v1284_v32, %v636_v16  ;;  %1223 = vrot.lane.b32.xlu1 %v488_v53, %s2067_s7 }
 0x104   : > { %1095 = vrot.lane.b32.xlu0 %v3966_v38, %s2066_s6 }
 0x105   : > { %v642_v26 = vpop.permute.xlu1 %641 }
 0x106   : > { %v3046_v34 = vsel %vm1292_vm3, %v1287_v56, %v642_v26  ;;  %v640_v6 = vpop.permute.xlu0 %639  ;;  %v3981_v26 = vld [vmem:[#allocation61_spill] sm:$0xff] }
 0x107   : > { %v3049_v37 = vsel %vm1292_vm3, %v1286_v21, %v640_v6  ;;  %933 = vrot.lane.b32.xlu1 %v3970_v55, %s2064_s4  ;;  %v3985_v6 = vld [vmem:[#allocation48_spill] sm:$0xff] }
 0x108   : > { %805 = vrot.lane.b32.xlu0 %v3971_v28, %s2063_s3 }
 0x109   : > { %v3055_v53 = vpop.permute.xlu1 %645 }
 0x10a   : > { %v3057_v46 = vpop.permute.xlu0 %643 }
 0x10b   : > { %901 = vrot.lane.b32.xlu1 %v3972_v52, %s2064_s4 }
 0x10c   : > { %1191 = vrot.lane.b32.xlu0 %v3973_v13, %s2067_s7 }
 0x10d   : > { %v3063_v59 = vpop.permute.xlu1 %649 }
 0x10e   : > { %v3065_v60 = vpop.permute.xlu0 %647 }
 0x10f   : > { %997 = vrot.lane.b32.xlu1 %v2303_v62, %s2065_s5 }
 0x110   : > { %1029 = vrot.lane.b32.xlu0 %v2814_v50, %s2065_s5 }
 0x111   : > { %v3071_v32 = vpop.permute.xlu1 %685 }
 0x112   : > { %3974 = vst [vmem:[#allocation65_spill] sm:$0xff] %v3071_v32  ;;  %v3073_v16 = vpop.permute.xlu0 %683 }
 0x113   : > { %3975 = vst [vmem:[#allocation24_spill] sm:$0xff] %v3073_v16  ;;  %835 = vrot.lane.b32.xlu1 %v3976_v47, %s2063_s3 }
 0x114   : > { %1125 = vrot.lane.b32.xlu0 %v2848_v1, %s2066_s6 }
 0x115   : > { %v3079_v33 = vpop.permute.xlu1 %689 }
 0x116   : > { %3977 = vst [vmem:[#allocation66_spill] sm:$0xff] %v3079_v33  ;;  %v3081_v56 = vpop.permute.xlu0 %687 }
 0x117   : > { %3978 = vst [vmem:[#allocation27_spill] sm:$0xff] %v3081_v56  ;;  %1221 = vrot.lane.b32.xlu1 %v2870_v11, %s2067_s7 }
 0x118   : > { %1093 = vrot.lane.b32.xlu0 %v2338_v20, %s2066_s6 }
 0x119   : > { %v3087_v62 = vpop.permute.xlu1 %693 }
 0x11a   : > { %3979 = vst [vmem:[#allocation67_spill] sm:$0xff] %v3087_v62  ;;  %v3089_v50 = vpop.permute.xlu0 %691 }
 0x11b   : > { %3980 = vst [vmem:[#allocation60_spill] sm:$0xff] %v3089_v50  ;;  %931 = vrot.lane.b32.xlu1 %v3981_v26, %s2064_s4 }
 0x11c   : > { %803 = vrot.lane.b32.xlu0 %v3982_v9, %s2063_s3 }
 0x11d   : > { %v3095_v1 = vpop.permute.xlu1 %697 }
 0x11e   : > { %3983 = vst [vmem:[#allocation19_spill] sm:$0xff] %v3095_v1  ;;  %v3097_v21 = vpop.permute.xlu0 %695  ;;  %v4008_v1 = vld [vmem:[#allocation43_spill] sm:$0xff] }
 0x11f   : > { %3984 = vst [vmem:[#allocation47_spill] sm:$0xff] %v3097_v21  ;;  %899 = vrot.lane.b32.xlu1 %v3985_v6, %s2064_s4  ;;  %v4005_v21 = vld [vmem:[#allocation56_spill] sm:$0xff] }
 0x120   : > { %1189 = vrot.lane.b32.xlu0 %v2594_v10, %s2067_s7 }
 0x121   : > { %v3103_v20 = vpop.permute.xlu1 %701 }
 0x122   : > { %v3105_v11 = vpop.permute.xlu0 %699 }
 0x123   : > { %995 = vrot.lane.b32.xlu1 %v2309_v3, %s2065_s5 }
 0x124   : > { %1027 = vrot.lane.b32.xlu0 %v2895_v39, %s2065_s5 }
 0x125   : > { %v3111_v61 = vpop.permute.xlu1 %705 }
 0x126   : > { %v3113_v16 = vpop.permute.xlu0 %703 }
 0x127   : > { %833 = vrot.lane.b32.xlu1 %v3986_v18, %s2063_s3 }
 0x128   : > { %1123 = vrot.lane.b32.xlu0 %v2931_v43, %s2066_s6 }
 0x129   : > { %v3119_v10 = vpop.permute.xlu1 %709 }
 0x12a   : > { %v3121_v32 = vpop.permute.xlu0 %707 }
 0x12b   : > { %1219 = vrot.lane.b32.xlu1 %v2957_v48, %s2067_s7 }
 0x12c   : > { %1091 = vrot.lane.b32.xlu0 %v2343_v27, %s2066_s6 }
 0x12d   : > { %v3127_v3 = vpop.permute.xlu1 %713 }
 0x12e   : > { %v3129_v39 = vpop.permute.xlu0 %711 }
 0x12f   : > { %929 = vrot.lane.b32.xlu1 %v3987_v24, %s2064_s4 }
 0x130   : > { %801 = vrot.lane.b32.xlu0 %v3988_v57, %s2063_s3 }
 0x131   : > { %v3135_v43 = vpop.permute.xlu1 %717 }
 0x132   : > { %3989 = vst [vmem:[#allocation34_spill] sm:$0xff] %v3135_v43  ;;  %v3137_v56 = vpop.permute.xlu0 %715 }
 0x133   : > { %3990 = vst [vmem:[#allocation61_spill] sm:$0xff] %v3137_v56  ;;  %897 = vrot.lane.b32.xlu1 %v3991_v5, %s2064_s4  ;;  %v3997_v56 = vld [vmem:[#allocation33_spill] sm:$0xff] }
 0x134   : > { %1187 = vrot.lane.b32.xlu0 %v2599_v63, %s2067_s7 }
 0x135   : > { %v3143_v27 = vpop.permute.xlu1 %721 }
 0x136   : > { %3992 = vst [vmem:[#allocation20_spill] sm:$0xff] %v3143_v27  ;;  %v3145_v48 = vpop.permute.xlu0 %719  ;;  %v4000_v27 = vld [vmem:[#allocation59_spill] sm:$0xff] }
 0x137   : > { %3993 = vst [vmem:[#allocation48_spill] sm:$0xff] %v3145_v48  ;;  %993 = vrot.lane.b32.xlu1 %v3994_v25, %s2065_s5 }
 0x138   : > { %1025 = vrot.lane.b32.xlu0 %v2457_v49, %s2065_s5 }
 0x139   : > { %v3151_v33 = vpop.permute.xlu1 %725 }
 0x13a   : > { %3995 = vst [vmem:[#allocation32_spill] sm:$0xff] %v3151_v33  ;;  %v3153_v43 = vpop.permute.xlu0 %723 }
 0x13b   : > { %3996 = vst [vmem:[#allocation58_spill] sm:$0xff] %v3153_v43  ;;  %831 = vrot.lane.b32.xlu1 %v3997_v56, %s2063_s3  ;;  %v4003_v43 = vld [vmem:[#allocation16_spill] sm:$0xff] }
 0x13c   : > { %1121 = vrot.lane.b32.xlu0 %v2483_v41, %s2066_s6 }
 0x13d   : > { %v3159_v63 = vpop.permute.xlu1 %729 }
 0x13e   : > { %3998 = vst [vmem:[#allocation17_spill] sm:$0xff] %v3159_v63  ;;  %v3161_v2 = vpop.permute.xlu0 %727 }
 0x13f   : > { %3999 = vst [vmem:[#allocation45_spill] sm:$0xff] %v3161_v2  ;;  %1217 = vrot.lane.b32.xlu1 %v3970_v55, %s2067_s7  ;;  %v4007_v2 = vld [vmem:[#allocation70_spill] sm:$0xff] }
 0x140   : > { %1089 = vrot.lane.b32.xlu0 %v3971_v28, %s2066_s6 }
 0x141   : > { %v3167_v25 = vpop.permute.xlu1 %733 }
 0x142   : > { %v3169_v48 = vpop.permute.xlu0 %731 }
 0x143   : > { %927 = vrot.lane.b32.xlu1 %v4000_v27, %s2064_s4 }
 0x144   : > { %799 = vrot.lane.b32.xlu0 %v4001_v51, %s2063_s3 }
 0x145   : > { %v3175_v41 = vpop.permute.xlu1 %737 }
 0x146   : > { %v3177_v50 = vpop.permute.xlu0 %735 }
 0x147   : > { %895 = vrot.lane.b32.xlu1 %v4002_v23, %s2064_s4 }
 0x148   : > { %1185 = vrot.lane.b32.xlu0 %v3972_v52, %s2067_s7 }
 0x149   : > { %v3183_v55 = vpop.permute.xlu1 %741 }
 0x14a   : > { %v3185_v28 = vpop.permute.xlu0 %739 }
 0x14b   : > { %991 = vrot.lane.b32.xlu1 %v4003_v43, %s2065_s5 }
 0x14c   : > { %1023 = vrot.lane.b32.xlu0 %v2463_v8, %s2065_s5 }
 0x14d   : > { %v842_v14 = vpop.permute.xlu1 %841 }
 0x14e   : > { %v746_v62 = vpop.permute.xlu0 %745 }
 0x14f   : > { %829 = vrot.lane.b32.xlu1 %v4004_v15, %s2063_s3 }
 0x150   : > { %1119 = vrot.lane.b32.xlu0 %v3976_v47, %s2066_s6  ;;  %v1291_v47 = vsel %vm1259_vm2, %v2457_v49, %v4007_v2 }
 0x151   : > { %v938_v33 = vpop.permute.xlu1 %937 }
 0x152   : > { %v810_v52 = vpop.permute.xlu0 %809 }
 0x153   : > { %1215 = vrot.lane.b32.xlu1 %v3981_v26, %s2067_s7  ;;  %v1324_v26 = vsel %vm1292_vm3, %v1291_v47, %v3063_v59  ;;  %v3216_v47 = vld [vmem:[%s2144_s27 + $0x98] sm:$0xff] }
 0x154   : > { %1087 = vrot.lane.b32.xlu0 %v3982_v9, %s2066_s6  ;;  %v1357_v9 = vsel %vm1325_vm4, %v1324_v26, %v746_v62 }
 0x155   : > { %v1034_v43 = vpop.permute.xlu1 %1033  ;;  %v1390_v49 = vsel %vm1358_vm5, %v1357_v9, %v842_v14 }
 0x156   : > { %v906_v0 = vpop.permute.xlu0 %905  ;;  %v1423_v59 = vsel %vm1391_vm6, %v1390_v49, %v938_v33  ;;  %v4009_v33 = vld [vmem:[#allocation31_spill] sm:$0xff] }
 0x157   : > { %925 = vrot.lane.b32.xlu1 %v4005_v21, %s2064_s4  ;;  %v1456_v62 = vsel %vm1424_vm7, %v1423_v59, %v1034_v43  ;;  %v1962_v49 = vld [vmem:[%s2144_s27 + $0xb0] sm:$0xff] }
 0x158   : > { %797 = vrot.lane.b32.xlu0 %v4006_v19, %s2063_s3  ;;  %v1275_v63 = vsel %vm1259_vm2, %v1962_v49, %v4010_v29 }
 0x159   : > { %v1002_v13 = vpop.permute.xlu1 %1001  ;;  %v1308_v43 = vsel %vm1292_vm3, %v1275_v63, %v2947_v4 }
 0x15a   : > { %v744_v31 = vpop.permute.xlu0 %743  ;;  %v1341_v59 = vsel %vm1325_vm4, %v1308_v43, %v3127_v3 }
 0x15b   : > { %893 = vrot.lane.b32.xlu1 %v4008_v1, %s2064_s4 }
 0x15c   : > { %1183 = vrot.lane.b32.xlu0 %v3985_v6, %s2067_s7 }
 0x15d   : > { %v840_v38 = vpop.permute.xlu1 %839 }
 0x15e   : > { %v1130_v2 = vpop.permute.xlu0 %1129 }
 0x15f   : > { %989 = vrot.lane.b32.xlu1 %v3216_v47, %s2065_s5  ;;  %v1489_v6 = vsel %vm1457_vm8, %v1456_v62, %v1130_v2 }
 0x160   : > { %1021 = vrot.lane.b32.xlu0 %v2435_v44, %s2065_s5 }
 0x161   : > { %v1226_v14 = vpop.permute.xlu1 %1225 }
 0x162   : > { %v1098_v26 = vpop.permute.xlu0 %1097  ;;  %v1522_v9 = vsel %vm1490_vm9, %v1489_v6, %v1226_v14  ;;  %v1374_v6 = vsel %vm1358_vm5, %v1341_v59, %v810_v52  ;;  %v4012_v52 = vld [vmem:[#allocation14_spill] sm:$0xff] }
 0x163   : > { %827 = vrot.lane.b32.xlu1 %v4009_v33, %s2063_s3  ;;  %1863 = vmatprep.subr.msk.mxu0 %vm1523_vm10, %v1522_v9  ;;  %v1407_v14 = vsel %vm1391_vm6, %v1374_v6, %v906_v0  ;;  %v4011_v9 = vld [vmem:[#allocation57_spill] sm:$0xff] }
 0x164   : > { %1117 = vrot.lane.b32.xlu0 %v3986_v18, %s2066_s6  ;;  %v1440_v18 = vsel %vm1424_vm7, %v1407_v14, %v1002_v13 }
 0x165   : > { %v936_v2 = vpop.permute.xlu1 %935  ;;  %v1473_v4 = vsel %vm1457_vm8, %v1440_v18, %v1098_v26  ;;  %v4014_v26 = vld [vmem:[#allocation44_spill] sm:$0xff] }
 0x166   : > { %v808_v62 = vpop.permute.xlu0 %807 }
 0x167   : > { %1213 = vrot.lane.b32.xlu1 %v3987_v24, %s2067_s7 }
 0x168   : > { %1085 = vrot.lane.b32.xlu0 %v3988_v57, %s2066_s6  ;;  %v4013_v57 = vld [vmem:[#allocation71_spill] sm:$0xff] }
 0x169   : > { %v904_v29 = vpop.permute.xlu1 %903  ;;  %v1290_v13 = vsel %vm1259_vm2, %v2463_v8, %v4013_v57 }
 0x16a   : > { %v1194_v63 = vpop.permute.xlu0 %1193  ;;  %v1323_v49 = vsel %vm1292_vm3, %v1290_v13, %v3065_v60 }
 0x16b   : > { %923 = vrot.lane.b32.xlu1 %v4011_v9, %s2064_s4  ;;  %v1506_v3 = vsel %vm1490_vm9, %v1473_v4, %v1194_v63  ;;  %v1356_v43 = vsel %vm1325_vm4, %v1323_v49, %v744_v31  ;;  %v1963_v4 = vld [vmem:[%s2144_s27 + $0x90] sm:$0xff] }
 0x16c   : > { %795 = vrot.lane.b32.xlu0 %v4012_v52, %s2063_s3  ;;  %1864 = vmatpush3.xpose.msk.msra.mxu0 %vm1523_vm10, %v1506_v3  ;;  %v1389_v6 = vsel %vm1358_vm5, %v1356_v43, %v840_v38  ;;  %v4015_v3 = vld [vmem:[#allocation28_spill] sm:$0xff]  ;;  %v1964_v38 = vld [vmem:[%s2144_s27 + $0xa8] sm:$0xff] }
 0x16d   : > { %v1000_v0 = vpop.permute.xlu1 %999  ;;  %v1422_v18 = vsel %vm1391_vm6, %v1389_v6, %v936_v2  ;;  %v4016_v2 = vld [vmem:[#allocation64_spill] sm:$0xff] }
 0x16e   : > { %v1032_v24 = vpop.permute.xlu0 %1031  ;;  %v1274_v57 = vsel %vm1259_vm2, %v1964_v38, %v4016_v2 }
 0x16f   : > { %891 = vrot.lane.b32.xlu1 %v4014_v26, %s2064_s4  ;;  %v1455_v8 = vsel %vm1424_vm7, %v1422_v18, %v1032_v24 }
 0x170   : > { %1181 = vrot.lane.b32.xlu0 %v3991_v5, %s2067_s7 }
 0x171   : > { %v838_v59 = vpop.permute.xlu1 %837 }
 0x172   : > { %v1128_v14 = vpop.permute.xlu0 %1127 }
 0x173   : > { %987 = vrot.lane.b32.xlu1 %v1963_v4, %s2065_s5  ;;  %v1488_v60 = vsel %vm1457_vm8, %v1455_v8, %v1128_v14  ;;  %v4017_v4 = vld [vmem:[#allocation54_spill] sm:$0xff]  ;;  %v4020_v8 = vld [vmem:[#allocation41_spill] sm:$0xff] }
 0x174   : > { %1019 = vrot.lane.b32.xlu0 %v2441_v17, %s2065_s5  ;;  %v1307_v17 = vsel %vm1292_vm3, %v1274_v57, %v2949_v30  ;;  %v1965_v57 = vld [vmem:[%s2144_s27 + $0x80] sm:$0xff] }
 0x175   : > { %v1224_v5 = vpop.permute.xlu1 %1223  ;;  %v1340_v13 = vsel %vm1325_vm4, %v1307_v17, %v3129_v39  ;;  %v1966_v17 = vld [vmem:[%s2144_s27 + $0x140] sm:$0xff] }
 0x176   : > { %v1521_v63 = vsel %vm1490_vm9, %v1488_v60, %v1224_v5  ;;  %v1096_v31 = vpop.permute.xlu0 %1095  ;;  %v1373_v43 = vsel %vm1358_vm5, %v1340_v13, %v808_v62  ;;  %v4018_v62 = vld [vmem:[#allocation11_spill] sm:$0xff] }
 0x177   : > { %825 = vrot.lane.b32.xlu1 %v4015_v3, %s2063_s3  ;;  %1865 = vmatprep.subr.msk.mxu0 %vm1523_vm10, %v1521_v63  ;;  %v1406_v6 = vsel %vm1391_vm6, %v1373_v43, %v904_v29  ;;  %v4019_v29 = vld [vmem:[#allocation68_spill] sm:$0xff]  ;;  %v4021_v43 = vld [vmem:[#allocation29_spill] sm:$0xff] }
 0x178   : > { %1115 = vrot.lane.b32.xlu0 %v3997_v56, %s2066_s6  ;;  %v1439_v56 = vsel %vm1424_vm7, %v1406_v6, %v1000_v0  ;;  %v1289_v0 = vsel %vm1259_vm2, %v2435_v44, %v4019_v29 }
 0x179   : > { %v934_v24 = vpop.permute.xlu1 %933  ;;  %v1472_v30 = vsel %vm1457_vm8, %v1439_v56, %v1096_v31  ;;  %v1322_v60 = vsel %vm1292_vm3, %v1289_v0, %v3055_v53  ;;  %v4023_v0 = vld [vmem:[#allocation55_spill] sm:$0xff] }
 0x17a   : > { %v806_v49 = vpop.permute.xlu0 %805  ;;  %v1355_v5 = vsel %vm1325_vm4, %v1322_v60, %v3183_v55 }
 0x17b   : > { %1211 = vrot.lane.b32.xlu1 %v4000_v27, %s2067_s7  ;;  %v1388_v31 = vsel %vm1358_vm5, %v1355_v5, %v838_v59  ;;  %v4022_v59 = vld [vmem:[#allocation62_spill] sm:$0xff] }
 0x17c   : > { %1083 = vrot.lane.b32.xlu0 %v4001_v51, %s2066_s6  ;;  %v1421_v2 = vsel %vm1391_vm6, %v1388_v31, %v934_v24  ;;  %v1273_v24 = vsel %vm1259_vm2, %v3216_v47, %v4022_v59  ;;  %v4026_v5 = vld [vmem:[#allocation42_spill] sm:$0xff]  ;;  %v4027_v59 = vld [vmem:[#allocation25_spill] sm:$0xff] }
 0x17d   : > { %v902_v14 = vpop.permute.xlu1 %901  ;;  %v1306_v6 = vsel %vm1292_vm3, %v1273_v24, %v2933_v40  ;;  %v1338_v24 = vsel %vm1325_vm4, %v2940_v45, %v3121_v32  ;;  %v4028_v32 = vld [vmem:[#allocation52_spill] sm:$0xff] }
 0x17e   : > { %v1192_v18 = vpop.permute.xlu0 %1191 }
 0x17f   : > { %v1505_v39 = vsel %vm1490_vm9, %v1472_v30, %v1192_v18  ;;  %921 = vrot.lane.b32.xlu1 %v4017_v4, %s2064_s4  ;;  %v1339_v30 = vsel %vm1325_vm4, %v1306_v6, %v3119_v10 }
 0x180   : > { %793 = vrot.lane.b32.xlu0 %v4018_v62, %s2063_s3  ;;  %1866 = vmatpush3.xpose.msk.msra.mxu0 %vm1523_vm10, %v1505_v39  ;;  %v1372_v39 = vsel %vm1358_vm5, %v1339_v30, %v806_v49  ;;  %v4024_v49 = vld [vmem:[#allocation12_spill] sm:$0xff] }
 0x181   : > { %v998_v27 = vpop.permute.xlu1 %997 }
 0x182   : > { %v1030_v51 = vpop.permute.xlu0 %1029 }
 0x183   : > { %889 = vrot.lane.b32.xlu1 %v4020_v8, %s2064_s4  ;;  %v1454_v44 = vsel %vm1424_vm7, %v1421_v2, %v1030_v51  ;;  %v1405_v51 = vsel %vm1391_vm6, %v1372_v39, %v902_v14  ;;  %v1967_v14 = vld [vmem:[%s2144_s27 + $0x150] sm:$0xff] }
 0x184   : > { %1179 = vrot.lane.b32.xlu0 %v4002_v23, %s2067_s7 }
 0x185   : > { %v836_v63 = vpop.permute.xlu1 %835 }
 0x186   : > { %v1126_v38 = vpop.permute.xlu0 %1125 }
 0x187   : > { %985 = vrot.lane.b32.xlu1 %v1965_v57, %s2065_s5  ;;  %v1487_v53 = vsel %vm1457_vm8, %v1454_v44, %v1126_v38 }
 0x188   : > { %1017 = vrot.lane.b32.xlu0 %v1966_v17, %s2065_s5 }
 0x189   : > { %v1222_v23 = vpop.permute.xlu1 %1221 }
 0x18a   : > { %v1520_v13 = vsel %vm1490_vm9, %v1487_v53, %v1222_v23  ;;  %v1094_v55 = vpop.permute.xlu0 %1093  ;;  %v1968_v53 = vld [vmem:[%s2144_s27 + $0x78] sm:$0xff] }
 0x18b   : > { %823 = vrot.lane.b32.xlu1 %v4021_v43, %s2063_s3  ;;  %1867 = vmatprep.subr.msk.mxu0 %vm1523_vm10, %v1520_v13  ;;  %v1969_v13 = vld [vmem:[%s2144_s27 + $0x138] sm:$0xff] }
 0x18c   : > { %1113 = vrot.lane.b32.xlu0 %v4004_v15, %s2066_s6  ;;  %v1438_v15 = vsel %vm1424_vm7, %v1405_v51, %v998_v27  ;;  %v4025_v27 = vld [vmem:[#allocation69_spill] sm:$0xff] }
 0x18d   : > { %v932_v56 = vpop.permute.xlu1 %931  ;;  %v1471_v40 = vsel %vm1457_vm8, %v1438_v15, %v1094_v55  ;;  %v1288_v60 = vsel %vm1259_vm2, %v1967_v14, %v4025_v27  ;;  %v1970_v14 = vld [vmem:[%s2144_s27 + $0x68] sm:$0xff] }
 0x18e   : > { %v804_v18 = vpop.permute.xlu0 %803  ;;  %v1321_v31 = vsel %vm1292_vm3, %v1288_v60, %v3057_v46  ;;  %v1971_v60 = vld [vmem:[%s2144_s27 + $0x128] sm:$0xff] }
 0x18f   : > { %1209 = vrot.lane.b32.xlu1 %v4005_v21, %s2067_s7  ;;  %v1354_v38 = vsel %vm1325_vm4, %v1321_v31, %v3185_v28 }
 0x190   : > { %1081 = vrot.lane.b32.xlu0 %v4006_v19, %s2066_s6  ;;  %v1387_v57 = vsel %vm1358_vm5, %v1354_v38, %v836_v63 }
 0x191   : > { %v900_v47 = vpop.permute.xlu1 %899  ;;  %v1420_v17 = vsel %vm1391_vm6, %v1387_v57, %v932_v56  ;;  %v1371_v56 = vsel %vm1358_vm5, %v1338_v24, %v804_v18  ;;  %v1337_v57 = vsel %vm1325_vm4, %v2920_v36, %v3111_v61  ;;  %v4032_v61 = vld [vmem:[#allocation53_spill] sm:$0xff] }
 0x192   : > { %v1190_v29 = vpop.permute.xlu0 %1189  ;;  %v1404_v30 = vsel %vm1391_vm6, %v1371_v56, %v900_v47  ;;  %v4030_v47 = vld [vmem:[#allocation39_spill] sm:$0xff] }
 0x193   : > { %v1504_v10 = vsel %vm1490_vm9, %v1471_v40, %v1190_v29  ;;  %919 = vrot.lane.b32.xlu1 %v4023_v0, %s2064_s4  ;;  %v1353_v40 = vsel %vm1325_vm4, %v3046_v34, %v3175_v41  ;;  %v4031_v41 = vld [vmem:[#allocation26_spill] sm:$0xff] }
 0x194   : > { %791 = vrot.lane.b32.xlu0 %v4024_v49, %s2063_s3  ;;  %1868 = vmatpush3.xpose.msk.msra.mxu0 %vm1523_vm10, %v1504_v10 }
 0x195   : > { %v996_v21 = vpop.permute.xlu1 %995 }
 0x196   : > { %v1028_v19 = vpop.permute.xlu0 %1027  ;;  %v1437_v39 = vsel %vm1424_vm7, %v1404_v30, %v996_v21  ;;  %v1972_v30 = vld [vmem:[%s2144_s27 + $0x60] sm:$0xff] }
 0x197   : > { %887 = vrot.lane.b32.xlu1 %v4026_v5, %s2064_s4  ;;  %v1453_v23 = vsel %vm1424_vm7, %v1420_v17, %v1028_v19 }
 0x198   : > { %1177 = vrot.lane.b32.xlu0 %v4008_v1, %s2067_s7 }
 0x199   : > { %v834_v2 = vpop.permute.xlu1 %833 }
 0x19a   : > { %v1124_v44 = vpop.permute.xlu0 %1123  ;;  %v1386_v10 = vsel %vm1358_vm5, %v1353_v40, %v834_v2 }
 0x19b   : > { %983 = vrot.lane.b32.xlu1 %v1968_v53, %s2065_s5  ;;  %v1486_v46 = vsel %vm1457_vm8, %v1453_v23, %v1124_v44 }
 0x19c   : > { %1015 = vrot.lane.b32.xlu0 %v1969_v13, %s2065_s5 }
 0x19d   : > { %v1220_v1 = vpop.permute.xlu1 %1219 }
 0x19e   : > { %v1519_v55 = vsel %vm1490_vm9, %v1486_v46, %v1220_v1  ;;  %v1092_v28 = vpop.permute.xlu0 %1091 }
 0x19f   : > { %821 = vrot.lane.b32.xlu1 %v4027_v59, %s2063_s3  ;;  %1869 = vmatprep.subr.msk.mxu0 %vm1523_vm10, %v1519_v55  ;;  %v4034_v55 = vld [vmem:[#allocation40_spill] sm:$0xff] }
 0x1a0   : > { %1111 = vrot.lane.b32.xlu0 %v4009_v33, %s2066_s6  ;;  %v1470_v33 = vsel %vm1457_vm8, %v1437_v39, %v1092_v28  ;;  %v1352_v28 = vsel %vm1325_vm4, %v3049_v37, %v3177_v50  ;;  %v4035_v50 = vld [vmem:[#allocation22_spill] sm:$0xff] }
 0x1a1   : > { %v930_v63 = vpop.permute.xlu1 %929 }
 0x1a2   : > { %v802_v6 = vpop.permute.xlu0 %801  ;;  %v1419_v19 = vsel %vm1391_vm6, %v1386_v10, %v930_v63 }
 0x1a3   : > { %1207 = vrot.lane.b32.xlu1 %v4011_v9, %s2067_s7  ;;  %v4029_v9 = vld [vmem:[#allocation9_spill] sm:$0xff]  ;;  %v1370_v17 = vsel %vm1358_vm5, %v1337_v57, %v802_v6 }
 0x1a4   : > { %1079 = vrot.lane.b32.xlu0 %v4012_v52, %s2066_s6 }
 0x1a5   : > { %v898_v51 = vpop.permute.xlu1 %897 }
 0x1a6   : > { %v1188_v15 = vpop.permute.xlu0 %1187  ;;  %v1403_v53 = vsel %vm1391_vm6, %v1370_v17, %v898_v51  ;;  %v1973_v51 = vld [vmem:[%s2144_s27 + $0x120] sm:$0xff] }
 0x1a7   : > { %v1503_v45 = vsel %vm1490_vm9, %v1470_v33, %v1188_v15  ;;  %917 = vrot.lane.b32.xlu1 %v4028_v32, %s2064_s4 }
 0x1a8   : > { %789 = vrot.lane.b32.xlu0 %v4029_v9, %s2063_s3  ;;  %1870 = vmatpush3.xpose.msk.msra.mxu0 %vm1523_vm10, %v1503_v45 }
 0x1a9   : > { %v994_v18 = vpop.permute.xlu1 %993 }
 0x1aa   : > { %v1026_v52 = vpop.permute.xlu0 %1025  ;;  %v1436_v23 = vsel %vm1424_vm7, %v1403_v53, %v994_v18  ;;  %v1336_v18 = vsel %vm1325_vm4, %v2923_v54, %v3113_v16  ;;  %v4036_v16 = vld [vmem:[#allocation50_spill] sm:$0xff] }
 0x1ab   : > { %885 = vrot.lane.b32.xlu1 %v4030_v47, %s2064_s4  ;;  %v1452_v27 = vsel %vm1424_vm7, %v1419_v19, %v1026_v52 }
 0x1ac   : > { %1175 = vrot.lane.b32.xlu0 %v4014_v26, %s2067_s7 }
 0x1ad   : > { %v832_v29 = vpop.permute.xlu1 %831 }
 0x1ae   : > { %v1122_v21 = vpop.permute.xlu0 %1121  ;;  %v1385_v24 = vsel %vm1358_vm5, %v1352_v28, %v832_v29 }
 0x1af   : > { %981 = vrot.lane.b32.xlu1 %v1970_v14, %s2065_s5  ;;  %v1485_v26 = vsel %vm1457_vm8, %v1452_v27, %v1122_v21  ;;  %v4038_v27 = vld [vmem:[#allocation37_spill] sm:$0xff] }
 0x1b0   : > { %1013 = vrot.lane.b32.xlu0 %v1971_v60, %s2065_s5  ;;  %v1351_v60 = vsel %vm1325_vm4, %v3031_v22, %v3167_v25  ;;  %v4039_v25 = vld [vmem:[#allocation23_spill] sm:$0xff] }
 0x1b1   : > { %v1218_v31 = vpop.permute.xlu1 %1217 }
 0x1b2   : > { %v1518_v38 = vsel %vm1490_vm9, %v1485_v26, %v1218_v31  ;;  %v1090_v34 = vpop.permute.xlu0 %1089 }
 0x1b3   : > { %819 = vrot.lane.b32.xlu1 %v4031_v41, %s2063_s3  ;;  %1871 = vmatprep.subr.msk.mxu0 %vm1523_vm10, %v1518_v38 }
 0x1b4   : > { %1109 = vrot.lane.b32.xlu0 %v4015_v3, %s2066_s6  ;;  %v1469_v3 = vsel %vm1457_vm8, %v1436_v23, %v1090_v34 }
 0x1b5   : > { %v928_v2 = vpop.permute.xlu1 %927 }
 0x1b6   : > { %v800_v44 = vpop.permute.xlu0 %799  ;;  %v1418_v56 = vsel %vm1391_vm6, %v1385_v24, %v928_v2  ;;  %v1974_v2 = vld [vmem:[%s2144_s27 + $0x50] sm:$0xff]  ;;  %v4042_v24 = vld [vmem:[#allocation38_spill] sm:$0xff] }
 0x1b7   : > { %1205 = vrot.lane.b32.xlu1 %v4017_v4, %s2067_s7  ;;  %v4033_v4 = vld [vmem:[#allocation10_spill] sm:$0xff]  ;;  %v1369_v40 = vsel %vm1358_vm5, %v1336_v18, %v800_v44  ;;  %v1975_v44 = vld [vmem:[%s2144_s27 + $0x110] sm:$0xff]  ;;  %v1334_v18 = vsel %vm1325_vm4, %v2905_v12, %v3105_v11 }
 0x1b8   : > { %1077 = vrot.lane.b32.xlu0 %v4018_v62, %s2066_s6  ;;  %v4043_v11 = vld [vmem:[#allocation6_spill] sm:$0xff] }
 0x1b9   : > { %v896_v13 = vpop.permute.xlu1 %895 }
 0x1ba   : > { %v1186_v46 = vpop.permute.xlu0 %1185  ;;  %v1402_v29 = vsel %vm1391_vm6, %v1369_v40, %v896_v13  ;;  %v1335_v13 = vsel %vm1325_vm4, %v2901_v58, %v3103_v20  ;;  %v4040_v20 = vld [vmem:[#allocation51_spill] sm:$0xff] }
 0x1bb   : > { %v1502_v36 = vsel %vm1490_vm9, %v1469_v3, %v1186_v46  ;;  %915 = vrot.lane.b32.xlu1 %v4032_v61, %s2064_s4 }
 0x1bc   : > { %787 = vrot.lane.b32.xlu0 %v4033_v4, %s2063_s3  ;;  %1872 = vmatpush3.xpose.msk.msra.mxu0 %vm1523_vm10, %v1502_v36 }
 0x1bd   : > { %v992_v1 = vpop.permute.xlu1 %991 }
 0x1be   : > { %v1024_v62 = vpop.permute.xlu0 %1023  ;;  %v1435_v10 = vsel %vm1424_vm7, %v1402_v29, %v992_v1 }
 0x1bf   : > { %883 = vrot.lane.b32.xlu1 %v4034_v55, %s2064_s4  ;;  %v1451_v39 = vsel %vm1424_vm7, %v1418_v56, %v1024_v62 }
 0x1c0   : > { %1173 = vrot.lane.b32.xlu0 %v4020_v8, %s2067_s7 }
 0x1c1   : > { %v830_v63 = vpop.permute.xlu1 %829 }
 0x1c2   : > { %v1120_v6 = vpop.permute.xlu0 %1119  ;;  %v1384_v31 = vsel %vm1358_vm5, %v1351_v60, %v830_v63 }
 0x1c3   : > { %979 = vrot.lane.b32.xlu1 %v1972_v30, %s2065_s5  ;;  %v1484_v8 = vsel %vm1457_vm8, %v1451_v39, %v1120_v6  ;;  %v1350_v6 = vsel %vm1325_vm4, %v3034_v35, %v3169_v48 }
 0x1c4   : > { %1011 = vrot.lane.b32.xlu0 %v1973_v51, %s2065_s5 }
 0x1c5   : > { %v1216_v33 = vpop.permute.xlu1 %1215 }
 0x1c6   : > { %v1517_v15 = vsel %vm1490_vm9, %v1484_v8, %v1216_v33  ;;  %v1088_v37 = vpop.permute.xlu0 %1087  ;;  %v1976_v8 = vld [vmem:[%s2144_s27 + $0x48] sm:$0xff] }
 0x1c7   : > { %817 = vrot.lane.b32.xlu1 %v4035_v50, %s2063_s3  ;;  %1873 = vmatprep.subr.msk.mxu0 %vm1523_vm10, %v1517_v15  ;;  %v1977_v15 = vld [vmem:[%s2144_s27 + $0x108] sm:$0xff] }
 0x1c8   : > { %1107 = vrot.lane.b32.xlu0 %v4021_v43, %s2066_s6  ;;  %v1468_v43 = vsel %vm1457_vm8, %v1435_v10, %v1088_v37 }
 0x1c9   : > { %v926_v45 = vpop.permute.xlu1 %925 }
 0x1ca   : > { %v798_v52 = vpop.permute.xlu0 %797  ;;  %v1417_v34 = vsel %vm1391_vm6, %v1384_v31, %v926_v45  ;;  %v1978_v31 = vld [vmem:[%s2144_s27 + $0x38] sm:$0xff] }
 0x1cb   : > { %1203 = vrot.lane.b32.xlu1 %v4023_v0, %s2067_s7  ;;  %v4037_v0 = vld [vmem:[#allocation7_spill] sm:$0xff]  ;;  %v1368_v46 = vsel %vm1358_vm5, %v1335_v13, %v798_v52 }
 0x1cc   : > { %1075 = vrot.lane.b32.xlu0 %v4024_v49, %s2066_s6 }
 0x1cd   : > { %v894_v21 = vpop.permute.xlu1 %893 }
 0x1ce   : > { %v1184_v19 = vpop.permute.xlu0 %1183  ;;  %v1401_v36 = vsel %vm1391_vm6, %v1368_v46, %v894_v21 }
 0x1cf   : > { %v1501_v54 = vsel %vm1490_vm9, %v1468_v43, %v1184_v19  ;;  %913 = vrot.lane.b32.xlu1 %v4036_v16, %s2064_s4  ;;  %v4044_v43 = vld [vmem:[#allocation35_spill] sm:$0xff]  ;;  %v4045_v19 = vld [vmem:[#allocation17_spill] sm:$0xff] }
 0x1d0   : > { %785 = vrot.lane.b32.xlu0 %v4037_v0, %s2063_s3  ;;  %1874 = vmatpush3.xpose.msk.msra.mxu0 %vm1523_vm10, %v1501_v54  ;;  %v4046_v54 = vld [vmem:[#allocation86_spill] sm:$0xff] }
 0x1d1   : > { %v990_v14 = vpop.permute.xlu1 %989 }
 0x1d2   : > { %v1022_v49 = vpop.permute.xlu0 %1021  ;;  %v1434_v1 = vsel %vm1424_vm7, %v1401_v36, %v990_v14  ;;  %v1349_v14 = vsel %vm1325_vm4, %v4046_v54, %v4045_v19  ;;  %v4058_v19 = vld [vmem:[#allocation84_spill] sm:$0xff] }
 0x1d3   : > { %881 = vrot.lane.b32.xlu1 %v4038_v27, %s2064_s4  ;;  %v1450_v57 = vsel %vm1424_vm7, %v1417_v34, %v1022_v49  ;;  %v1979_v34 = vld [vmem:[%s2144_s27 + $0xf8] sm:$0xff] }
 0x1d4   : > { %1171 = vrot.lane.b32.xlu0 %v4026_v5, %s2067_s7 }
 0x1d5   : > { %v828_v26 = vpop.permute.xlu1 %827 }
 0x1d6   : > { %v1118_v38 = vpop.permute.xlu0 %1117  ;;  %v1383_v30 = vsel %vm1358_vm5, %v1350_v6, %v828_v26  ;;  %v4054_v6 = vld [vmem:[#allocation87_spill] sm:$0xff] }
 0x1d7   : > { %977 = vrot.lane.b32.xlu1 %v1974_v2, %s2065_s5  ;;  %v1483_v5 = vsel %vm1457_vm8, %v1450_v57, %v1118_v38 }
 0x1d8   : > { %1009 = vrot.lane.b32.xlu0 %v1975_v44, %s2065_s5 }
 0x1d9   : > { %v1214_v17 = vpop.permute.xlu1 %1213 }
 0x1da   : > { %v1516_v53 = vsel %vm1490_vm9, %v1483_v5, %v1214_v17  ;;  %v1086_v22 = vpop.permute.xlu0 %1085  ;;  %v4047_v5 = vld [vmem:[#allocation21_spill] sm:$0xff] }
 0x1db   : > { %815 = vrot.lane.b32.xlu1 %v4039_v25, %s2063_s3  ;;  %1875 = vmatprep.subr.msk.mxu0 %vm1523_vm10, %v1516_v53  ;;  %v4048_v53 = vld [vmem:[#allocation19_spill] sm:$0xff] }
 0x1dc   : > { %1105 = vrot.lane.b32.xlu0 %v4027_v59, %s2066_s6  ;;  %v1467_v59 = vsel %vm1457_vm8, %v1434_v1, %v1086_v22  ;;  %v4049_v22 = vld [vmem:[#allocation78_spill] sm:$0xff] }
 0x1dd   : > { %v924_v23 = vpop.permute.xlu1 %923 }
 0x1de   : > { %v796_v3 = vpop.permute.xlu0 %795  ;;  %v1416_v51 = vsel %vm1391_vm6, %v1383_v30, %v924_v23  ;;  %v1333_v23 = vsel %vm1325_vm4, %v4049_v22, %v4048_v53 }
 0x1df   : > { %1201 = vrot.lane.b32.xlu1 %v4028_v32, %s2067_s7  ;;  %v4041_v32 = vld [vmem:[#allocation8_spill] sm:$0xff]  ;;  %v1367_v40 = vsel %vm1358_vm5, %v1334_v18, %v796_v3 }
 0x1e0   : > { %1073 = vrot.lane.b32.xlu0 %v4029_v9, %s2066_s6 }
 0x1e1   : > { %v892_v62 = vpop.permute.xlu1 %891 }
 0x1e2   : > { %v1182_v28 = vpop.permute.xlu0 %1181  ;;  %v1400_v29 = vsel %vm1391_vm6, %v1367_v40, %v892_v62  ;;  %v4056_v40 = vld [vmem:[#allocation79_spill] sm:$0xff] }
 0x1e3   : > { %v1500_v58 = vsel %vm1490_vm9, %v1467_v59, %v1182_v28  ;;  %911 = vrot.lane.b32.xlu1 %v4040_v20, %s2064_s4  ;;  %v4050_v28 = vld [vmem:[#allocation49_spill] sm:$0xff] }
 0x1e4   : > { %783 = vrot.lane.b32.xlu0 %v4041_v32, %s2063_s3  ;;  %1876 = vmatpush3.xpose.msk.msra.mxu0 %vm1523_vm10, %v1500_v58  ;;  %v4051_v58 = vld [vmem:[#allocation5_spill] sm:$0xff] }
 0x1e5   : > { %v988_v63 = vpop.permute.xlu1 %987 }
 0x1e6   : > { %v1020_v9 = vpop.permute.xlu0 %1019 }
 0x1e7   : > { %879 = vrot.lane.b32.xlu1 %v4042_v24, %s2064_s4  ;;  %v1449_v33 = vsel %vm1424_vm7, %v1416_v51, %v1020_v9  ;;  %v4053_v9 = vld [vmem:[#allocation45_spill] sm:$0xff] }
 0x1e8   : > { %1169 = vrot.lane.b32.xlu0 %v4030_v47, %s2067_s7 }
 0x1e9   : > { %v826_v56 = vpop.permute.xlu1 %825 }
 0x1ea   : > { %v1116_v39 = vpop.permute.xlu0 %1115 }
 0x1eb   : > { %975 = vrot.lane.b32.xlu1 %v1976_v8, %s2065_s5  ;;  %v1482_v47 = vsel %vm1457_vm8, %v1449_v33, %v1116_v39  ;;  %v3584_v39 = vld [vmem:[%s3771_s1] sm:$0xff] }
 0x1ec   : > { %1007 = vrot.lane.b32.xlu0 %v1977_v15, %s2065_s5  ;;  %1895 = vmatprep.mubr.msk.f32.mxu0 %vm1523_vm10, %v3584_v39  ;;  %v1980_v15 = vld [vmem:[%s2144_s27 + $0x30] sm:$0xff] }
 0x1ed   : > { %v1212_v37 = vpop.permute.xlu1 %1211 }
 0x1ee   : > { %v1515_v45 = vsel %vm1490_vm9, %v1482_v47, %v1212_v37  ;;  %v1084_v35 = vpop.permute.xlu0 %1083  ;;  %v1981_v47 = vld [vmem:[%s2144_s27 + $0xf0] sm:$0xff]  ;;  %s1713_s27 = scalar_lea.hbm %s3772_s2, %s1862_s24 }
 0x1ef   : > { %813 = vrot.lane.b32.xlu1 %v2360_v42, %s2063_s3  ;;  %1877 = vmatprep.subr.msk.mxu0 %vm1523_vm10, %v1515_v45  ;;  %v1433_v42 = vsel %vm1424_vm7, %v1400_v29, %v988_v63  ;;  %v4052_v63 = vld [vmem:[#allocation36_spill] sm:$0xff] }
 0x1f0   : > { %1103 = vrot.lane.b32.xlu0 %v4031_v41, %s2066_s6  ;;  %v1466_v41 = vsel %vm1457_vm8, %v1433_v42, %v1084_v35 }
 0x1f1   : > { %v922_v48 = vpop.permute.xlu1 %921 }
 0x1f2   : > { %v794_v52 = vpop.permute.xlu0 %793 }
 0x1f3   : > { %1199 = vrot.lane.b32.xlu1 %v4032_v61, %s2067_s7  ;;  %v1366_v3 = vsel %vm1358_vm5, %v1333_v23, %v794_v52  ;;  %v4055_v52 = vld [vmem:[#allocation47_spill] sm:$0xff] }
 0x1f4   : > { %1071 = vrot.lane.b32.xlu0 %v4033_v4, %s2066_s6  ;;  %v1332_v29 = vsel %vm1325_vm4, %v4056_v40, %v4055_v52 }
 0x1f5   : > { %v890_v10 = vpop.permute.xlu1 %889 }
 0x1f6   : > { %v1180_v21 = vpop.permute.xlu0 %1179  ;;  %v1399_v46 = vsel %vm1391_vm6, %v1366_v3, %v890_v10 }
 0x1f7   : > { %v1499_v12 = vsel %vm1490_vm9, %v1466_v41, %v1180_v21  ;;  %909 = vrot.lane.b32.xlu1 %v2607_v7, %s2064_s4  ;;  %v1382_v7 = vsel %vm1358_vm5, %v1349_v14, %v826_v56  ;;  %v1348_v56 = vsel %vm1325_vm4, %v4054_v6, %v4053_v9 }
 0x1f8   : > { %781 = vrot.lane.b32.xlu0 %v4043_v11, %s2063_s3  ;;  %1878 = vmatpush3.xpose.msk.msra.mxu0 %vm1523_vm10, %v1499_v12  ;;  %v1415_v26 = vsel %vm1391_vm6, %v1382_v7, %v922_v48 }
 0x1f9   : > { %v986_v61 = vpop.permute.xlu1 %985 }
 0x1fa   : > { %v1018_v4 = vpop.permute.xlu0 %1017  ;;  %v1432_v36 = vsel %vm1424_vm7, %v1399_v46, %v986_v61 }
 0x1fb   : > { %877 = vrot.lane.b32.xlu1 %v4044_v43, %s2064_s4  ;;  %v1448_v38 = vsel %vm1424_vm7, %v1415_v26, %v1018_v4  ;;  %v4057_v43 = vld [vmem:[#allocation32_spill] sm:$0xff] }
 0x1fc   : > { %1167 = vrot.lane.b32.xlu0 %v4034_v55, %s2067_s7 }
 0x1fd   : > { %v824_v49 = vpop.permute.xlu1 %823 }
 0x1fe   : > { %v1114_v60 = vpop.permute.xlu0 %1113  ;;  %v1381_v51 = vsel %vm1358_vm5, %v1348_v56, %v824_v49 }
 0x1ff   : > { %973 = vrot.lane.b32.xlu1 %v1978_v31, %s2065_s5  ;;  %v1481_v55 = vsel %vm1457_vm8, %v1448_v38, %v1114_v60 }
 0x200   : > { %1005 = vrot.lane.b32.xlu0 %v1979_v34, %s2065_s5 }
 0x201   : > { %v1210_v2 = vpop.permute.xlu1 %1209 }
 0x202   : > { %v1514_v57 = vsel %vm1490_vm9, %v1481_v55, %v1210_v2  ;;  %v1082_v44 = vpop.permute.xlu0 %1081  ;;  %v4059_v55 = vld [vmem:[#allocation67_spill] sm:$0xff]  ;;  %v4060_v2 = vld [vmem:[#allocation76_spill] sm:$0xff] }
 0x203   : > { %811 = vrot.lane.b32.xlu1 %v4047_v5, %s2063_s3  ;;  %1879 = vmatprep.subr.msk.mxu0 %vm1523_vm10, %v1514_v57  ;;  %v1331_v57 = vsel %vm1325_vm4, %v4060_v2, %v4059_v55 }
 0x204   : > { %1101 = vrot.lane.b32.xlu0 %v4035_v50, %s2066_s6  ;;  %v1465_v50 = vsel %vm1457_vm8, %v1432_v36, %v1082_v44 }
 0x205   : > { %v920_v17 = vpop.permute.xlu1 %919 }
 0x206   : > { %v792_v13 = vpop.permute.xlu0 %791  ;;  %v1414_v33 = vsel %vm1391_vm6, %v1381_v51, %v920_v17  ;;  %v4063_v51 = vld [vmem:[#allocation60_spill] sm:$0xff] }
 0x207   : > { %1197 = vrot.lane.b32.xlu1 %v4036_v16, %s2067_s7  ;;  %v1365_v10 = vsel %vm1358_vm5, %v1332_v29, %v792_v13  ;;  %v4065_v29 = vld [vmem:[#allocation20_spill] sm:$0xff] }
 0x208   : > { %1069 = vrot.lane.b32.xlu0 %v4037_v0, %s2066_s6 }
 0x209   : > { %v888_v1 = vpop.permute.xlu1 %887 }
 0x20a   : > { %v1178_v62 = vpop.permute.xlu0 %1177  ;;  %v1398_v41 = vsel %vm1391_vm6, %v1365_v10, %v888_v1  ;;  %v4061_v1 = vld [vmem:[#allocation58_spill] sm:$0xff] }
 0x20b   : > { %v1498_v59 = vsel %vm1490_vm9, %v1465_v50, %v1178_v62  ;;  %907 = vrot.lane.b32.xlu1 %v4050_v28, %s2064_s4  ;;  %v4062_v50 = vld [vmem:[#allocation85_spill] sm:$0xff] }
 0x20c   : > { %779 = vrot.lane.b32.xlu0 %v4051_v58, %s2063_s3  ;;  %1880 = vmatpush3.xpose.msk.msra.mxu0 %vm1523_vm10, %v1498_v59  ;;  %v1346_v62 = vsel %vm1325_vm4, %v4062_v50, %v4061_v1  ;;  %s1988_s3 = scalar_lea.vmem %s1987_s30, 512 }
 0x20d   : > { %v984_v16 = vpop.permute.xlu1 %983  ;;  %p1990_p2 = scmp.lt.s32.totalorder %s1988_s3, %s1982_s29 }
 0x20e   : > { %v1016_v0 = vpop.permute.xlu0 %1015 }
 0x20f   : > { %875 = vrot.lane.b32.xlu1 %v4052_v63, %s2064_s4  ;;  %p1991_p3 = por %p1990_p2, %p1989_p1 }
 0x210   : > { %1165 = vrot.lane.b32.xlu0 %v4038_v27, %s2067_s7  ;;  %v1447_v27 = vsel %vm1424_vm7, %v1414_v33, %v1016_v0 }
 0x211   : > { %v822_v30 = vpop.permute.xlu1 %821  ;;  %p1992_p5 = pnand %p1991_p3, %p1985_p0 }
 0x212   : > { %v1112_v8 = vpop.permute.xlu0 %1111 }
 0x213   : > { %971 = vrot.lane.b32.xlu1 %v1980_v15, %s2065_s5  ;;  %v1480_v37 = vsel %vm1457_vm8, %v1447_v27, %v1112_v8  ;;  %v4064_v8 = vld [vmem:[#allocation77_spill] sm:$0xff] }
 0x214   : > { %1003 = vrot.lane.b32.xlu0 %v1981_v47, %s2065_s5  ;;  %v1330_v33 = vsel %vm1325_vm4, %v4064_v8, %v4063_v51 }
 0x215   : > { %v1208_v45 = vpop.permute.xlu1 %1207 }
 0x216   : > { %v1513_v35 = vsel %vm1490_vm9, %v1480_v37, %v1208_v45  ;;  %v1080_v48 = vpop.permute.xlu0 %1079 }
 0x217   : > { %1067 = vrot.lane.b32.xlu1 %v4041_v32, %s2066_s6  ;;  %1881 = vmatprep.subr.msk.mxu0 %vm1523_vm10, %v1513_v35  ;;  %v1431_v32 = vsel %vm1424_vm7, %v1398_v41, %v984_v16 }
 0x218   : > { %1099 = vrot.lane.b32.xlu0 %v4039_v25, %s2066_s6  ;;  %v1464_v25 = vsel %vm1457_vm8, %v1431_v32, %v1080_v48 }
 0x219   : > { %v918_v18 = vpop.permute.xlu1 %917 }
 0x21a   : > { %v790_v42 = vpop.permute.xlu0 %789 }
 0x21b   : > { %1163 = vrot.lane.b32.xlu1 %v4042_v24, %s2067_s7  ;;  %v1347_v24 = vsel %vm1325_vm4, %v4058_v19, %v4057_v43  ;;  %v1364_v5 = vsel %vm1358_vm5, %v1331_v57, %v790_v42  ;;  %v4066_v42 = vld [vmem:[#allocation82_spill] sm:$0xff]  ;;  %v4069_v57 = vld [vmem:[#allocation48_spill] sm:$0xff] }
 0x21c   : > { %1195 = vrot.lane.b32.xlu0 %v4040_v20, %s2067_s7  ;;  %v1380_v14 = vsel %vm1358_vm5, %v1347_v24, %v822_v30  ;;  %v1345_v10 = vsel %vm1325_vm4, %v4066_v42, %v4065_v29  ;;  %v4067_v24 = vld [vmem:[#allocation66_spill] sm:$0xff] }
 0x21d   : > { %v886_v21 = vpop.permute.xlu1 %885  ;;  %v1413_v49 = vsel %vm1391_vm6, %v1380_v14, %v918_v18 }
 0x21e   : > { %v1176_v12 = vpop.permute.xlu0 %1175  ;;  %v1397_v17 = vsel %vm1391_vm6, %v1364_v5, %v886_v21 }
 0x21f   : > { %v1497_v11 = vsel %vm1490_vm9, %v1464_v25, %v1176_v12 }
 0x220   : > { %1882 = vmatpush3.xpose.msk.msra.mxu0 %vm1523_vm10, %v1497_v11 }
 0x221   : > { %v982_v61 = vpop.permute.xlu1 %981 }
 0x222   : > { %v1014_v4 = vpop.permute.xlu0 %1013  ;;  %v1430_v53 = vsel %vm1424_vm7, %v1397_v17, %v982_v61 }
 0x223   : > { %v1446_v7 = vsel %vm1424_vm7, %v1413_v49, %v1014_v4 }
 0x225   : > { %v820_v54 = vpop.permute.xlu1 %819 }
 0x226   : > { %v1110_v20 = vpop.permute.xlu0 %1109  ;;  %v1379_v28 = vsel %vm1358_vm5, %v1346_v62, %v820_v54  ;;  %v4068_v54 = vld [vmem:[#allocation74_spill] sm:$0xff]  ;;  %v4071_v62 = vld [vmem:[#allocation27_spill] sm:$0xff] }
 0x227   : > { %v1479_v60 = vsel %vm1457_vm8, %v1446_v7, %v1110_v20  ;;  %v1329_v14 = vsel %vm1325_vm4, %v4068_v54, %v4067_v24 }
 0x229   : > { %v1206_v26 = vpop.permute.xlu1 %1205 }
 0x22a   : > { %v1512_v31 = vsel %vm1490_vm9, %v1479_v60, %v1206_v26  ;;  %v1078_v38 = vpop.permute.xlu0 %1077 }
 0x22b   : > { %1883 = vmatprep.subr.msk.mxu0 %vm1523_vm10, %v1512_v31  ;;  %v1463_v23 = vsel %vm1457_vm8, %v1430_v53, %v1078_v38 }
 0x22d   : > { %v916_v34 = vpop.permute.xlu1 %915 }
 0x22e   : > { %v788_v44 = vpop.permute.xlu0 %787  ;;  %v1412_v16 = vsel %vm1391_vm6, %v1379_v28, %v916_v34 }
 0x22f   : > { %v1363_v27 = vsel %vm1358_vm5, %v1330_v33, %v788_v44  ;;  %v4070_v44 = vld [vmem:[#allocation83_spill] sm:$0xff]  ;;  %v4073_v33 = vld [vmem:[#allocation34_spill] sm:$0xff] }
 0x230   : > { %v1344_v5 = vsel %vm1325_vm4, %v4070_v44, %v4069_v57 }
 0x231   : > { %v884_v22 = vpop.permute.xlu1 %883 }
 0x232   : > { %v1174_v13 = vpop.permute.xlu0 %1173  ;;  %v1396_v47 = vsel %vm1391_vm6, %v1363_v27, %v884_v22 }
 0x233   : > { %v1496_v3 = vsel %vm1490_vm9, %v1463_v23, %v1174_v13 }
 0x234   : > { %1884 = vmatpush3.xpose.msk.msra.mxu0 %vm1523_vm10, %v1496_v3 }
 0x235   : > { %v980_v46 = vpop.permute.xlu1 %979 }
 0x236   : > { %v1012_v36 = vpop.permute.xlu0 %1011  ;;  %v1429_v37 = vsel %vm1424_vm7, %v1396_v47, %v980_v46 }
 0x237   : > { %v1445_v0 = vsel %vm1424_vm7, %v1412_v16, %v1012_v36 }
 0x239   : > { %v818_v59 = vpop.permute.xlu1 %817 }
 0x23a   : > { %v1108_v58 = vpop.permute.xlu0 %1107  ;;  %v1378_v32 = vsel %vm1358_vm5, %v1345_v10, %v818_v59  ;;  %v4072_v59 = vld [vmem:[#allocation75_spill] sm:$0xff]  ;;  %v4075_v10 = vld [vmem:[#allocation65_spill] sm:$0xff] }
 0x23b   : > { %v1478_v63 = vsel %vm1457_vm8, %v1445_v0, %v1108_v58  ;;  %v1328_v28 = vsel %vm1325_vm4, %v4072_v59, %v4071_v62 }
 0x23d   : > { %v1204_v9 = vpop.permute.xlu1 %1203 }
 0x23e   : > { %v1511_v6 = vsel %vm1490_vm9, %v1478_v63, %v1204_v9  ;;  %v1076_v56 = vpop.permute.xlu0 %1075 }
 0x23f   : > { %1885 = vmatprep.subr.msk.mxu0 %vm1523_vm10, %v1511_v6  ;;  %v1462_v35 = vsel %vm1457_vm8, %v1429_v37, %v1076_v56 }
 0x241   : > { %v914_v30 = vpop.permute.xlu1 %913 }
 0x242   : > { %v786_v15 = vpop.permute.xlu0 %785  ;;  %v1411_v25 = vsel %vm1391_vm6, %v1378_v32, %v914_v30 }
 0x243   : > { %v1362_v49 = vsel %vm1358_vm5, %v1329_v14, %v786_v15  ;;  %v4074_v15 = vld [vmem:[#allocation80_spill] sm:$0xff] }
 0x244   : > { %v1343_v27 = vsel %vm1325_vm4, %v4074_v15, %v4073_v33  ;;  %v4077_v14 = vld [vmem:[#allocation24_spill] sm:$0xff] }
 0x245   : > { %v882_v45 = vpop.permute.xlu1 %881 }
 0x246   : > { %v1172_v48 = vpop.permute.xlu0 %1171  ;;  %v1395_v7 = vsel %vm1391_vm6, %v1362_v49, %v882_v45 }
 0x247   : > { %v1495_v18 = vsel %vm1490_vm9, %v1462_v35, %v1172_v48 }
 0x248   : > { %1886 = vmatpush3.xpose.msk.msra.mxu0 %vm1523_vm10, %v1495_v18 }
 0x249   : > { %v978_v52 = vpop.permute.xlu1 %977 }
 0x24a   : > { %v1010_v40 = vpop.permute.xlu0 %1009  ;;  %v1428_v60 = vsel %vm1424_vm7, %v1395_v7, %v978_v52 }
 0x24b   : > { %v1444_v12 = vsel %vm1424_vm7, %v1411_v25, %v1010_v40 }
 0x24d   : > { %v816_v41 = vpop.permute.xlu1 %815 }
 0x24e   : > { %v1106_v21 = vpop.permute.xlu0 %1105  ;;  %v1377_v53 = vsel %vm1358_vm5, %v1344_v5, %v816_v41  ;;  %v4076_v41 = vld [vmem:[#allocation72_spill] sm:$0xff] }
 0x24f   : > { %v1477_v11 = vsel %vm1457_vm8, %v1444_v12, %v1106_v21  ;;  %v1327_v32 = vsel %vm1325_vm4, %v4076_v41, %v4075_v10 }
 0x251   : > { %v1202_v61 = vpop.permute.xlu1 %1201 }
 0x252   : > { %v1510_v4 = vsel %vm1490_vm9, %v1477_v11, %v1202_v61  ;;  %v1074_v43 = vpop.permute.xlu0 %1073 }
 0x253   : > { %1887 = vmatprep.subr.msk.mxu0 %vm1523_vm10, %v1510_v4  ;;  %v1461_v31 = vsel %vm1457_vm8, %v1428_v60, %v1074_v43  ;;  %v4079_v60 = vld [vmem:[#allocation61_spill] sm:$0xff] }
 0x255   : > { %v912_v19 = vpop.permute.xlu1 %911 }
 0x256   : > { %v784_v20 = vpop.permute.xlu0 %783  ;;  %v1410_v23 = vsel %vm1391_vm6, %v1377_v53, %v912_v19 }
 0x257   : > { %v1361_v16 = vsel %vm1358_vm5, %v1328_v28, %v784_v20  ;;  %v4078_v20 = vld [vmem:[#allocation73_spill] sm:$0xff] }
 0x258   : > { %v1326_v49 = vsel %vm1325_vm4, %v4078_v20, %v4077_v14 }
 0x259   : > { %v880_v26 = vpop.permute.xlu1 %879 }
 0x25a   : > { %v1170_v38 = vpop.permute.xlu0 %1169  ;;  %v1394_v0 = vsel %vm1391_vm6, %v1361_v16, %v880_v26  ;;  %v4080_v26 = vld [vmem:[#allocation81_spill] sm:$0xff] }
 0x25b   : > { %v1494_v34 = vsel %vm1490_vm9, %v1461_v31, %v1170_v38  ;;  %v1342_v31 = vsel %vm1325_vm4, %v4080_v26, %v4079_v60 }
 0x25c   : > { %1888 = vmatpush3.xpose.msk.msra.mxu0 %vm1523_vm10, %v1494_v34 }
 0x25d   : > { %v976_v55 = vpop.permute.xlu1 %975 }
 0x25e   : > { %v1008_v2 = vpop.permute.xlu0 %1007  ;;  %v1427_v63 = vsel %vm1424_vm7, %v1394_v0, %v976_v55 }
 0x25f   : > { %v1443_v13 = vsel %vm1424_vm7, %v1410_v23, %v1008_v2 }
 0x261   : > { %v814_v17 = vpop.permute.xlu1 %813 }
 0x262   : > { %v1104_v22 = vpop.permute.xlu0 %1103  ;;  %v1376_v37 = vsel %vm1358_vm5, %v1343_v27, %v814_v17 }
 0x263   : > { %v1476_v3 = vsel %vm1457_vm8, %v1443_v13, %v1104_v22 }
 0x265   : > { %v1200_v46 = vpop.permute.xlu1 %1199 }
 0x266   : > { %v1509_v36 = vsel %vm1490_vm9, %v1476_v3, %v1200_v46  ;;  %v1072_v1 = vpop.permute.xlu0 %1071 }
 0x267   : > { %1889 = vmatprep.subr.msk.mxu0 %vm1523_vm10, %v1509_v36  ;;  %v1460_v6 = vsel %vm1457_vm8, %v1427_v63, %v1072_v1 }
 0x269   : > { %v910_v50 = vpop.permute.xlu1 %909 }
 0x26a   : > { %v782_v58 = vpop.permute.xlu0 %781  ;;  %v1409_v35 = vsel %vm1391_vm6, %v1376_v37, %v910_v50 }
 0x26b   : > { %v1360_v25 = vsel %vm1358_vm5, %v1327_v32, %v782_v58 }
 0x26d   : > { %v878_v9 = vpop.permute.xlu1 %877 }
 0x26e   : > { %v1168_v56 = vpop.permute.xlu0 %1167  ;;  %v1393_v12 = vsel %vm1391_vm6, %v1360_v25, %v878_v9 }
 0x26f   : > { %v1493_v30 = vsel %vm1490_vm9, %v1460_v6, %v1168_v56 }
 0x270   : > { %1890 = vmatpush3.xpose.msk.msra.mxu0 %vm1523_vm10, %v1493_v30 }
 0x271   : > { %v974_v51 = vpop.permute.xlu1 %973 }
 0x272   : > { %v1006_v8 = vpop.permute.xlu0 %1005  ;;  %v1426_v11 = vsel %vm1424_vm7, %v1393_v12, %v974_v51 }
 0x273   : > { %v1442_v48 = vsel %vm1424_vm7, %v1409_v35, %v1006_v8 }
 0x275   : > { %v812_v47 = vpop.permute.xlu1 %811 }
 0x276   : > { %v1102_v45 = vpop.permute.xlu0 %1101  ;;  %v1375_v55 = vsel %vm1358_vm5, %v1342_v31, %v812_v47 }
 0x277   : > { %v1475_v18 = vsel %vm1457_vm8, %v1442_v48, %v1102_v45 }
 0x279   : > { %v1198_v52 = vpop.permute.xlu1 %1197 }
 0x27a   : > { %v1508_v40 = vsel %vm1490_vm9, %v1475_v18, %v1198_v52  ;;  %v1070_v29 = vpop.permute.xlu0 %1069 }
 0x27b   : > { %1891 = vmatprep.subr.msk.mxu0 %vm1523_vm10, %v1508_v40  ;;  %v1459_v4 = vsel %vm1457_vm8, %v1426_v11, %v1070_v29 }
 0x27d   : > { %v908_v42 = vpop.permute.xlu1 %907 }
 0x27e   : > { %v780_v21 = vpop.permute.xlu0 %779  ;;  %v1408_v57 = vsel %vm1391_vm6, %v1375_v55, %v908_v42 }
 0x27f   : > { %v1359_v38 = vsel %vm1358_vm5, %v1326_v49, %v780_v21 }
 0x281   : > { %v876_v61 = vpop.permute.xlu1 %875 }
 0x282   : > { %v1166_v43 = vpop.permute.xlu0 %1165  ;;  %v1392_v2 = vsel %vm1391_vm6, %v1359_v38, %v876_v61 }
 0x283   : > { %v1492_v19 = vsel %vm1490_vm9, %v1459_v4, %v1166_v43 }
 0x284   : > { %1892 = vmatpush3.xpose.msk.msra.mxu0 %vm1523_vm10, %v1492_v19 }
 0x285   : > { %v972_v24 = vpop.permute.xlu1 %971 }
 0x286   : > { %v1004_v54 = vpop.permute.xlu0 %1003  ;;  %v1425_v44 = vsel %vm1424_vm7, %v1392_v2, %v972_v24 }
 0x287   : > { %v1441_v5 = vsel %vm1424_vm7, %v1408_v57, %v1004_v54 }
 0x289   : > { %v1068_v7 = vpop.permute.xlu1 %1067 }
 0x28a   : > { %v1100_v34 = vpop.permute.xlu0 %1099  ;;  %v1458_v17 = vsel %vm1457_vm8, %v1425_v44, %v1068_v7 }
 0x28b   : > { %v1474_v22 = vsel %vm1457_vm8, %v1441_v5, %v1100_v34 }
 0x28d   : > { %v1164_v53 = vpop.permute.xlu1 %1163 }
 0x28e   : > { %v1491_v23 = vsel %vm1490_vm9, %v1458_v17, %v1164_v53  ;;  %v1196_v13 = vpop.permute.xlu0 %1195 }
 0x28f   : > { %v1507_v3 = vsel %vm1490_vm9, %v1474_v22, %v1196_v13 }
 0x290   : > { %1893 = vmatprep.subr.msk.mxu0 %vm1523_vm10, %v1507_v3 }
 0x291   : > { %1894 = vmatpush3.xpose.msk.msra.mxu0 %vm1523_vm10, %v1491_v23 }
 0x294   : > { %1896 = vmatmul.mubr.msk.f32.vlgmr.msra.gmra.mxu0 %vm1523_vm10, %v3584_v39 }
 0x354   : > { %v1689_v46 = vpop.f32.mrf.mxu0 }
 0x355   : > { %1694 = vst [vmem:[%s182_s20] sm:$0xff] %v1689_v46 }
 0x356   : > { %v1691_v36 = vpop.f32.mrf.mxu0 }
 0x357   : > { %1695 = vst [vmem:[%s182_s20 + $0x8] sm:$0xff] %v1691_v36 }
 0x358   : > { %1995 = shalt.err (!%p1992_p5)
}
 0x359   : > { %s1996_s4 = scalar_lea.hbm %s1713_s27, 256  ;;  %s2000_s7 = scalar_lea.hbm %s3772_s2, 512 }
 0x35a   : > { %p1997_p6 = scmp.ne.s32.totalorder %s1713_s27, %s1996_s4  ;;  %p2001_p10 = scmp.lt.s32.totalorder %s1713_s27, %s3772_s2 }
 0x35b   : > { %p2002_p11 = scmp.lt.s32.totalorder %s2000_s7, %s1996_s4 }
 0x35c   : > { %p1998_p7 = pnand %p1997_p6, %p2124_p4 }
 0x35d   : > { %p2003_p12 = por %p2002_p11, %p2001_p10 }
 0x35e   : > { %p1999_p9 = pneg %p1998_p7 }
 0x360   : > { %p2004_p13 = pnand %p2003_p12, %p1999_p9 }
 0x362   : > { %2007 = shalt.err (!%p2004_p13)
}
 0x363   : > { %1898 = dma.vmem_to_hbm [thread:$0]  (%p2124_p4), %s3727_s23, 256, %s1713_s27, %s1697_s28  }
 0x364 PF: > { %p1904_p0 = scmp.ge.s32.totalorder %s2058_s14, 2  ;;  %s1727_s16 = sand.u32 1, %s2038_s9  }
 0x365   : > { %s1728_s18 = scalar_lea.sflag [#allocation3], %s1727_s16 }
 0x366   : > { %p1901_p1 = pnand %p1904_p0, %p2131_p8 }
 0x368   : > { %p1902_p2 = pneg %p1901_p1 }
 0x36a   : > { %2033 = dma.done.wait (%p1902_p2), %s1728_s18, 256  }
 0x36b   : > { %2035 = vsyncadd (%p1902_p2), %s1728_s18, 4294967040  ;;  %s15_s14 = sadd.s32 1, %s2058_s14   ;;  %s4081_s9 = smov %s2042_s10 }
 0x36c   : > { %p12_p3 = scmp.ge.s32.totalorder %s15_s14, 4   ;;  %s4082_s10 = smov %s2046_s11 }
 0x36d   : > { %s4083_s11 = smov %s2137_s22  ;;  %s4084_s12 = smov %s2054_s13 }
 0x36e   : > { %s4085_s13 = smov %s4087_s17  ;;  %14 = sbr.rel (!%p12_p3) target bundleno = 4 (0x4), region = 67 }
 0x373   :  { %1733 = vsyncpa [#allocation3], 1 }
 0x374   :  { %1735 = vsyncpa [#allocation3 + $0x1], 1 }

</bundles_post_ra>
